<compile_context>
chip_gen: v7x
topology: tpu7x:2x2x1
jax: 0.10.0
libtpu: 0.0.40
codegen_flags: <defaults>
</compile_context>

<pallas_src>
import functools

import jax
import jax.numpy as jnp
from jax.experimental import pallas as pl
from jax.experimental.pallas import tpu as pltpu

EMBEDDING_DIM  = 32
ENCODE_DIM     = 32
HIDDEN_DIM     = 32
VOCAB_SIZE     = 64
OUTPUT_CLASSES = 4            # root2label is never used in forward()
BATCH_SIZE     = 2
NEG_INF        = -1e9         # torch pad_packed padding_value

_VMEM = pl.BlockSpec(memory_space=pltpu.MemorySpace.VMEM)


def _next_pow2(n):
    return 1 if n <= 1 else 1 << (n - 1).bit_length()


# ---------------------------------------------------------------------------
# Pallas kernel 1: fused BatchTreeEncoder numeric path.
#   wc_out  = emb_rows @ W_c + b_c                (bf16 operands, f32 result)
#   entries = M @ wc_out                           (structural 0/1 plan matrix:
#             child accumulation + node_list index_copy for every call level)
#   out     = max over call levels (torch.max(node_list, 0)[0])
# ---------------------------------------------------------------------------
def _tree_encoder_kernel(emb_ref, wc_ref, bc_ref, m_ref, o_ref, *, n_calls, s_pad):
    wc_out = (jnp.dot(emb_ref[...], wc_ref[...],
                      preferred_element_type=jnp.float32)
              + bc_ref[...])                                        # (R, D) f32
    # Plan matmul kept in f32: M is 0/1, so this is an exact select/sum.
    entries = jnp.dot(m_ref[...], wc_out,
                      preferred_element_type=jnp.float32)           # (C*S, D)
    pooled = entries[0:s_pad, :]
    for c in range(1, n_calls):                                     # static, small
        pooled = jnp.maximum(pooled, entries[c * s_pad:(c + 1) * s_pad, :])
    # TODO(synk): for large row counts add a ("parallel",) row grid (v7x: 2 TCs)
    # and stage into a 128-lane slab before the store (v5e narrow-store note).
    o_ref[...] = pooled


# ---------------------------------------------------------------------------
# Pallas kernel 2: fused BiGRU (packed-sequence semantics) + time max-pool
#                  + hidden2label.
#   Gate layout: per direction padded to 128 lanes -> [r|z|n|pad] ; forward in
#   columns 0:128 of gi_all, backward in 128:256.
# ---------------------------------------------------------------------------
def _bigru_pool_label_kernel(x_ref, mask_ref, wi_ref, bi_ref,
                             whf_ref, whb_ref, bhf_ref, bhb_ref,
                             wlf_ref, wlb_ref, bl_ref, o_ref, *, T, Bp, H):
    # One hoisted input projection for ALL timesteps and both directions.
    gi_all = (jnp.dot(x_ref[...], wi_ref[...],
                      preferred_element_type=jnp.float32)
              + bi_ref[...])                                        # (T*Bp, 256) f32
    whf = whf_ref[...]                                              # (H, 128) bf16
    whb = whb_ref[...]
    bhf = bhf_ref[...]                                              # (1, 128) f32
    bhb = bhb_ref[...]

    h_f = jnp.zeros((Bp, H), jnp.float32)                           # init_hidden()
    h_b = jnp.zeros((Bp, H), jnp.float32)
    mx_f = jnp.full((Bp, H), NEG_INF, jnp.float32)                  # pad value -1e9
    mx_b = jnp.full((Bp, H), NEG_INF, jnp.float32)

    def cell(gi, gh, h):
        r = jax.nn.sigmoid(gi[:, 0:H] + gh[:, 0:H])
        z = jax.nn.sigmoid(gi[:, H:2 * H] + gh[:, H:2 * H])
        n = jnp.tanh(gi[:, 2 * H:3 * H] + r * gh[:, 2 * H:3 * H])
        return (1.0 - z) * n + z * h

    # Fully unrolled: T is bucketed (power of two) and small.
    # TODO(synk): for large T switch to lax.fori_loop over gi_all.reshape(T,Bp,256).
    for s in range(T):
        t_f, t_b = s, T - 1 - s
        gi_f = gi_all[t_f * Bp:(t_f + 1) * Bp, 0:128]               # 8-row / 128-lane
        gi_b = gi_all[t_b * Bp:(t_b + 1) * Bp, 128:256]             # aligned views
        gh_f = jnp.dot(h_f.astype(jnp.bfloat16), whf,
                       preferred_element_type=jnp.float32) + bhf
        gh_b = jnp.dot(h_b.astype(jnp.bfloat16), whb,
                       preferred_element_type=jnp.float32) + bhb
        hf_new = cell(gi_f, gh_f, h_f)
        hb_new = cell(gi_b, gh_b, h_b)
        vf = mask_ref[t_f * Bp:(t_f + 1) * Bp, :] > 0.0             # (Bp, 1)
        vb = mask_ref[t_b * Bp:(t_b + 1) * Bp, :] > 0.0
        # pack_padded_sequence semantics: hidden advances only on valid steps.
        h_f = jnp.where(vf, hf_new, h_f)
        h_b = jnp.where(vb, hb_new, h_b)
        # pad_packed(padding_value=-1e9) + F.max_pool1d over time.
        mx_f = jnp.maximum(mx_f, jnp.where(vf, h_f, NEG_INF))
        mx_b = jnp.maximum(mx_b, jnp.where(vb, h_b, NEG_INF))

    # hidden2label (2H -> 1) as a lane reduction (no 1-lane MXU matmul).
    o_ref[...] = (jnp.sum(mx_f * wlf_ref[...], axis=1, keepdims=True)
                  + jnp.sum(mx_b * wlb_ref[...], axis=1, keepdims=True)
                  + bl_ref[...])


# ---------------------------------------------------------------------------
# Host-side plan construction (structure only; mirrors BatchTreeEncoder.traverse_mul)
# ---------------------------------------------------------------------------
def _build_plan(x):
    # TODO(synk): the recursive, data-dependent AST traversal has no Pallas
    # equivalent; it only produces index/selection tables consumed by the kernels.
    batch_lengths = [len(prog) for prog in x]
    statements = [st for prog in x for st in prog]
    n_stmts = len(statements)

    calls = []

    def traverse(node, batch_index):
        node_length = len(node)
        if not node_length:
            return None
        bi = list(batch_index)
        index, current_node = [], []
        children_index, children = [], []
        for i in range(node_length):
            if isinstance(node[i], list) and node[i][0] != -1:
                index.append(i)
                current_node.append(node[i][0])
                temp = node[i][1:]
                for j in range(len(temp)):
                    if isinstance(temp[j], list) and temp[j][0] != -1:
                        if len(children_index) <= j:
                            children_index.append([i])
                            children.append([temp[j]])
                        else:
                            children_index[j].append(i)
                            children[j].append(temp[j])
            else:
                bi[i] = -1
        cid = len(calls)
        rec = {"n": node_length, "index": index, "tokens": current_node,
               "children": [], "batch_index": None}
        calls.append(rec)
        for c in range(len(children)):
            bci = [bi[i] for i in children_index[c]]
            child_id = traverse(children[c], bci)
            if child_id is not None:
                rec["children"].append((child_id, children_index[c]))
        rec["batch_index"] = bi
        return cid

    traverse(statements, list(range(n_stmts)))

    offsets, total = [], 0
    for rec in calls:
        offsets.append(total)
        total += rec["n"]

    n_calls = len(calls)
    r_pad = max(8, _next_pow2(total))        # bucketed -> stable kernel shapes
    s_pad = max(8, _next_pow2(n_stmts))

    # Token id per tree-node row (VOCAB_SIZE -> appended all-zero embedding row).
    row_tok = [VOCAB_SIZE] * r_pad
    for rec, off in zip(calls, offsets):
        for pos, tok in zip(rec["index"], rec["tokens"]):
            row_tok[off + pos] = int(tok)

    # Transitive closure of the child-accumulation edges:
    # final(row) = sum over its subtree of W_c rows.
    subtree = [{r} for r in range(total)]
    for cid in range(n_calls - 1, -1, -1):               # children before parents
        rec, off = calls[cid], offsets[cid]
        for child_id, ch_idx in rec["children"]:
            coff = offsets[child_id]
            for k, parent_pos in enumerate(ch_idx):
                subtree[off + parent_pos] |= subtree[coff + k]

    # Dense 0/1 plan matrix: row (cid*s_pad + b) selects the subtree that call
    # level `cid` contributes to statement `b`; all-zero row == torch's zero entry.
    m = [[0.0] * r_pad for _ in range(n_calls * s_pad)]
    for cid, (rec, off) in enumerate(zip(calls, offsets)):
        for i, b in enumerate(rec["batch_index"]):
            if b != -1:
                row = cid * s_pad + b
                for s in subtree[off + i]:
                    m[row][s] = 1.0

    # BiGRU sequence layout: program batch padded to 8 sublanes, T bucketed.
    bp = max(8, _next_pow2(len(x)))
    t_pad = _next_pow2(max(batch_lengths))
    gidx = [0] * (t_pad * bp)
    mask = [0.0] * (t_pad * bp)
    stmt_off = [0]
    for L in batch_lengths:
        stmt_off.append(stmt_off[-1] + L)
    for ti in range(t_pad):
        for p, L in enumerate(batch_lengths):
            if ti < L:
                gidx[ti * bp + p] = stmt_off[p] + ti
                mask[ti * bp + p] = 1.0

    return {"n_calls": n_calls, "s_pad": s_pad, "r_pad": r_pad,
            "t_pad": t_pad, "bp": bp,
            "row_tok": row_tok, "m": m, "gidx": gidx, "mask": mask}


# ---------------------------------------------------------------------------
# One jitted forward per bucketed plan size (tokens / weights stay dynamic).
# ---------------------------------------------------------------------------
@functools.partial(jax.jit, static_argnums=(0, 1, 2, 3, 4))
def _forward_jit(n_calls, s_pad, r_pad, t_pad, bp, params, row_tok, m, gidx, mask):
    E, H = ENCODE_DIM, HIDDEN_DIM

    # ---- tree encoder: one fused Pallas kernel over ALL levels ---------------
    emb_ext = jnp.concatenate(
        [params["embedding"], jnp.zeros((1, EMBEDDING_DIM), jnp.float32)], axis=0)
    emb_rows = jnp.take(emb_ext, row_tok, axis=0).astype(jnp.bfloat16)  # (r_pad, E)
    tree_kernel = functools.partial(_tree_encoder_kernel,
                                    n_calls=n_calls, s_pad=s_pad)
    stmt_enc = pl.pallas_call(
        tree_kernel,
        out_shape=jax.ShapeDtypeStruct((s_pad, E), jnp.float32),
        in_specs=[_VMEM, _VMEM, _VMEM, _VMEM],
        out_specs=_VMEM,
    )(emb_rows, params["wc"].astype(jnp.bfloat16), params["bc"], m)

    # ---- time-major BiGRU input (single fused gather + mask under jit) -------
    x_flat = (jnp.take(stmt_enc, gidx, axis=0) * mask).astype(jnp.bfloat16)

    def pad_gates(w):            # (*, 3H) -> (*, 128): lane-aligned per direction
        return jnp.pad(w, ((0, 0), (0, 128 - 3 * H)))

    wi = jnp.concatenate([pad_gates(params["wi_f"]), pad_gates(params["wi_b"])],
                         axis=1).astype(jnp.bfloat16)               # (E, 256)
    bi = jnp.concatenate([pad_gates(params["bi_f"]), pad_gates(params["bi_b"])],
                         axis=1)                                    # (1, 256)
    whf = pad_gates(params["wh_f"]).astype(jnp.bfloat16)            # (H, 128)
    whb = pad_gates(params["wh_b"]).astype(jnp.bfloat16)
    bhf = pad_gates(params["bh_f"])                                 # (1, 128)
    bhb = pad_gates(params["bh_b"])
    wlf = params["wl"][:H].reshape(1, H)                            # hidden2label
    wlb = params["wl"][H:].reshape(1, H)

    gru_kernel = functools.partial(_bigru_pool_label_kernel, T=t_pad, Bp=bp, H=H)
    y = pl.pallas_call(
        gru_kernel,
        out_shape=jax.ShapeDtypeStruct((bp, 1), jnp.float32),
        in_specs=[_VMEM] * 11,
        out_specs=_VMEM,
    )(x_flat, mask, wi, bi, whf, whb, bhf, bhb, wlf, wlb, params["bl"])
    return y


def batch_program_classifier_forward(x, params):
    plan = _build_plan(x)
    y = _forward_jit(
        plan["n_calls"], plan["s_pad"], plan["r_pad"], plan["t_pad"], plan["bp"],
        params,
        jnp.asarray(plan["row_tok"], jnp.int32),
        jnp.asarray(plan["m"], jnp.float32),
        jnp.asarray(plan["gidx"], jnp.int32),
        jnp.asarray(plan["mask"], jnp.float32).reshape(-1, 1),
    )
    return y[:len(x)]                                   # strip program-batch padding


# ---------------------------------------------------------------------------
# Deterministic parameter init (torch-module shapes; linears stored transposed
# (in, out), biases as (1, out)).
# ---------------------------------------------------------------------------
def init_params(key):
    ks = jax.random.split(key, 13)
    scale = 0.1
    H, E = HIDDEN_DIM, ENCODE_DIM

    def rn(k, shape):
        return jax.random.normal(k, shape, jnp.float32) * scale

    return {
        "embedding": rn(ks[0], (VOCAB_SIZE, EMBEDDING_DIM)),   # nn.Embedding
        "wc": rn(ks[1], (EMBEDDING_DIM, ENCODE_DIM)),          # encoder.W_c
        "bc": rn(ks[2], (1, ENCODE_DIM)),
        # BiGRU forward dir: weight_ih_l0 (3H,E), weight_hh_l0 (3H,H) -> transposed
        "wi_f": rn(ks[3], (E, 3 * H)),
        "wh_f": rn(ks[4], (H, 3 * H)),
        "bi_f": rn(ks[5], (1, 3 * H)),
        "bh_f": rn(ks[6], (1, 3 * H)),
        # BiGRU reverse dir
        "wi_b": rn(ks[7], (E, 3 * H)),
        "wh_b": rn(ks[8], (H, 3 * H)),
        "bi_b": rn(ks[9], (1, 3 * H)),
        "bh_b": rn(ks[10], (1, 3 * H)),
        # hidden2label: nn.Linear(2H, 1)  (task == 'Time Prediction')
        "wl": rn(ks[11], (2 * H, 1)),
        "bl": rn(ks[12], (1, 1)),
    }


if __name__ == "__main__":
    key = jax.random.PRNGKey(0)
    pkey, tkey = jax.random.split(key)
    params = init_params(pkey)

    toks = [int(t) for t in jax.random.randint(tkey, (16,), 0, VOCAB_SIZE - 1)]
    # x: list (batch of programs) of lists (statement ASTs); each AST is a nested
    # list [token_id, child_subtree, child_subtree, ...].
    x = [
        [   # program 0: 3 statement trees
            [toks[0], [toks[1], [toks[2]]], [toks[3]]],
            [toks[4], [toks[5]]],
            [toks[6]],
        ],
        [   # program 1: 2 statement trees
            [toks[7], [toks[8]], [toks[9], [toks[10]], [toks[11]]]],
            [toks[12], [toks[13]]],
        ],
    ]

    y = batch_program_classifier_forward(x, params)
    y = jax.block_until_ready(y)
    assert y.shape == (BATCH_SIZE, 1) and y.dtype == jnp.float32
    print("KERNEL_OK")
</pallas_src>

<mosaic_0001>
module attributes {stable_mosaic.version = 11 : i64} {
  func.func @_tree_encoder_kernel(%arg0: memref<16x32xbf16, #tpu.memory_space<vmem>>, %arg1: memref<32x32xbf16, #tpu.memory_space<vmem>>, %arg2: memref<1x32xf32, #tpu.memory_space<vmem>>, %arg3: memref<48x16xf32, #tpu.memory_space<vmem>>, %arg4: memref<8x32xf32, #tpu.memory_space<vmem>>) attributes {dimension_semantics = [], scalar_prefetch = 0 : i64, scratch_operands = 0 : i64, tpu.core_type = #tpu.core_type<tc>} {
    %c0 = arith.constant 0 : index
    %c0_0 = arith.constant 0 : index
    %0 = vector.load %arg0[%c0, %c0_0] : memref<16x32xbf16, #tpu.memory_space<vmem>>, vector<16x32xbf16>
    %c0_1 = arith.constant 0 : index
    %c0_2 = arith.constant 0 : index
    %1 = vector.load %arg1[%c0_1, %c0_2] : memref<32x32xbf16, #tpu.memory_space<vmem>>, vector<32x32xbf16>
    %cst = arith.constant dense<0.000000e+00> : vector<16x32xf32>
    %2 = tpu.matmul %0, %1, %cst {dimension_numbers = #tpu.dot_dimension_numbers<[1], [0], [0], [1], [0, 0, 1, 1], [], []>} : vector<16x32xbf16>, vector<32x32xbf16>, vector<16x32xf32> -> vector<16x32xf32>
    %c0_3 = arith.constant 0 : index
    %c0_4 = arith.constant 0 : index
    %3 = vector.load %arg2[%c0_3, %c0_4] : memref<1x32xf32, #tpu.memory_space<vmem>>, vector<1x32xf32>
    %4 = vector.broadcast %3 : vector<1x32xf32> to vector<16x32xf32>
    %5 = arith.addf %2, %4 : vector<16x32xf32>
    %c0_5 = arith.constant 0 : index
    %c0_6 = arith.constant 0 : index
    %6 = vector.load %arg3[%c0_5, %c0_6] : memref<48x16xf32, #tpu.memory_space<vmem>>, vector<48x16xf32>
    %cst_7 = arith.constant dense<0.000000e+00> : vector<48x32xf32>
    %7 = tpu.matmul %6, %5, %cst_7 {dimension_numbers = #tpu.dot_dimension_numbers<[1], [0], [0], [1], [0, 0, 1, 1], [], []>} : vector<48x16xf32>, vector<16x32xf32>, vector<48x32xf32> -> vector<48x32xf32>
    %8 = vector.extract_strided_slice %7 {offsets = [0, 0], sizes = [8, 32], strides = [1, 1]} : vector<48x32xf32> to vector<8x32xf32>
    %9 = vector.extract_strided_slice %7 {offsets = [8, 0], sizes = [8, 32], strides = [1, 1]} : vector<48x32xf32> to vector<8x32xf32>
    %10 = arith.maximumf %8, %9 : vector<8x32xf32>
    %11 = vector.extract_strided_slice %7 {offsets = [16, 0], sizes = [8, 32], strides = [1, 1]} : vector<48x32xf32> to vector<8x32xf32>
    %12 = arith.maximumf %10, %11 : vector<8x32xf32>
    %13 = vector.extract_strided_slice %7 {offsets = [24, 0], sizes = [8, 32], strides = [1, 1]} : vector<48x32xf32> to vector<8x32xf32>
    %14 = arith.maximumf %12, %13 : vector<8x32xf32>
    %15 = vector.extract_strided_slice %7 {offsets = [32, 0], sizes = [8, 32], strides = [1, 1]} : vector<48x32xf32> to vector<8x32xf32>
    %16 = arith.maximumf %14, %15 : vector<8x32xf32>
    %17 = vector.extract_strided_slice %7 {offsets = [40, 0], sizes = [8, 32], strides = [1, 1]} : vector<48x32xf32> to vector<8x32xf32>
    %18 = arith.maximumf %16, %17 : vector<8x32xf32>
    %c0_8 = arith.constant 0 : index
    %c0_9 = arith.constant 0 : index
    %19 = vector.load %arg4[%c0_8, %c0_9] : memref<8x32xf32, #tpu.memory_space<vmem>>, vector<8x32xf32>
    tpu.vector_store %arg4[%c0_8, %c0_9], %18 {strides = array<i32>} : memref<8x32xf32, #tpu.memory_space<vmem>>, vector<8x32xf32>,
    return
  }
}

module attributes {stable_mosaic.version = 11 : i64} {
  func.func @_bigru_pool_label_kernel(%arg0: memref<32x32xbf16, #tpu.memory_space<vmem>>, %arg1: memref<32x1xf32, #tpu.memory_space<vmem>>, %arg2: memref<32x256xbf16, #tpu.memory_space<vmem>>, %arg3: memref<1x256xf32, #tpu.memory_space<vmem>>, %arg4: memref<32x128xbf16, #tpu.memory_space<vmem>>, %arg5: memref<32x128xbf16, #tpu.memory_space<vmem>>, %arg6: memref<1x128xf32, #tpu.memory_space<vmem>>, %arg7: memref<1x128xf32, #tpu.memory_space<vmem>>, %arg8: memref<1x32xf32, #tpu.memory_space<vmem>>, %arg9: memref<1x32xf32, #tpu.memory_space<vmem>>, %arg10: memref<1x1xf32, #tpu.memory_space<vmem>>, %arg11: memref<8x1xf32, #tpu.memory_space<vmem>>) attributes {dimension_semantics = [], scalar_prefetch = 0 : i64, scratch_operands = 0 : i64, tpu.core_type = #tpu.core_type<tc>} {
    %c0 = arith.constant 0 : index
    %c0_0 = arith.constant 0 : index
    %0 = vector.load %arg0[%c0, %c0_0] : memref<32x32xbf16, #tpu.memory_space<vmem>>, vector<32x32xbf16>
    %c0_1 = arith.constant 0 : index
    %c0_2 = arith.constant 0 : index
    %1 = vector.load %arg2[%c0_1, %c0_2] : memref<32x256xbf16, #tpu.memory_space<vmem>>, vector<32x256xbf16>
    %cst = arith.constant dense<0.000000e+00> : vector<32x256xf32>
    %2 = tpu.matmul %0, %1, %cst {dimension_numbers = #tpu.dot_dimension_numbers<[1], [0], [0], [1], [0, 0, 1, 1], [], []>} : vector<32x32xbf16>, vector<32x256xbf16>, vector<32x256xf32> -> vector<32x256xf32>
    %c0_3 = arith.constant 0 : index
    %c0_4 = arith.constant 0 : index
    %3 = vector.load %arg3[%c0_3, %c0_4] : memref<1x256xf32, #tpu.memory_space<vmem>>, vector<1x256xf32>
    %4 = vector.broadcast %3 : vector<1x256xf32> to vector<32x256xf32>
    %5 = arith.addf %2, %4 : vector<32x256xf32>
    %c0_5 = arith.constant 0 : index
    %c0_6 = arith.constant 0 : index
    %6 = vector.load %arg4[%c0_5, %c0_6] : memref<32x128xbf16, #tpu.memory_space<vmem>>, vector<32x128xbf16>
    %c0_7 = arith.constant 0 : index
    %c0_8 = arith.constant 0 : index
    %7 = vector.load %arg5[%c0_7, %c0_8] : memref<32x128xbf16, #tpu.memory_space<vmem>>, vector<32x128xbf16>
    %c0_9 = arith.constant 0 : index
    %c0_10 = arith.constant 0 : index
    %8 = vector.load %arg6[%c0_9, %c0_10] : memref<1x128xf32, #tpu.memory_space<vmem>>, vector<1x128xf32>
    %c0_11 = arith.constant 0 : index
    %c0_12 = arith.constant 0 : index
    %9 = vector.load %arg7[%c0_11, %c0_12] : memref<1x128xf32, #tpu.memory_space<vmem>>, vector<1x128xf32>
    %cst_13 = arith.constant 0.000000e+00 : f32
    %10 = vector.broadcast %cst_13 : f32 to vector<8x32xf32>
    %cst_14 = arith.constant 0.000000e+00 : f32
    %11 = vector.broadcast %cst_14 : f32 to vector<8x32xf32>
    %cst_15 = arith.constant -1.000000e+09 : f32
    %12 = vector.broadcast %cst_15 : f32 to vector<8x32xf32>
    %cst_16 = arith.constant -1.000000e+09 : f32
    %13 = vector.broadcast %cst_16 : f32 to vector<8x32xf32>
    %14 = vector.extract_strided_slice %5 {offsets = [0, 0], sizes = [8, 128], strides = [1, 1]} : vector<32x256xf32> to vector<8x128xf32>
    %15 = vector.extract_strided_slice %5 {offsets = [24, 128], sizes = [8, 128], strides = [1, 1]} : vector<32x256xf32> to vector<8x128xf32>
    %16 = arith.truncf %10 : vector<8x32xf32> to vector<8x32xbf16>
    %cst_17 = arith.constant dense<0.000000e+00> : vector<8x128xf32>
    %17 = tpu.matmul %16, %6, %cst_17 {dimension_numbers = #tpu.dot_dimension_numbers<[1], [0], [0], [1], [0, 0, 1, 1], [], []>} : vector<8x32xbf16>, vector<32x128xbf16>, vector<8x128xf32> -> vector<8x128xf32>
    %18 = vector.broadcast %8 : vector<1x128xf32> to vector<8x128xf32>
    %19 = arith.addf %17, %18 : vector<8x128xf32>
    %20 = arith.truncf %11 : vector<8x32xf32> to vector<8x32xbf16>
    %cst_18 = arith.constant dense<0.000000e+00> : vector<8x128xf32>
    %21 = tpu.matmul %20, %7, %cst_18 {dimension_numbers = #tpu.dot_dimension_numbers<[1], [0], [0], [1], [0, 0, 1, 1], [], []>} : vector<8x32xbf16>, vector<32x128xbf16>, vector<8x128xf32> -> vector<8x128xf32>
    %22 = vector.broadcast %9 : vector<1x128xf32> to vector<8x128xf32>
    %23 = arith.addf %21, %22 : vector<8x128xf32>
    %24 = vector.extract_strided_slice %14 {offsets = [0, 0], sizes = [8, 32], strides = [1, 1]} : vector<8x128xf32> to vector<8x32xf32>
    %25 = vector.extract_strided_slice %19 {offsets = [0, 0], sizes = [8, 32], strides = [1, 1]} : vector<8x128xf32> to vector<8x32xf32>
    %26 = arith.addf %24, %25 : vector<8x32xf32>
    %27 = arith.negf %26 : vector<8x32xf32>
    %28 = math.exp %27 : vector<8x32xf32>
    %cst_19 = arith.constant 1.000000e+00 : f32
    %29 = vector.broadcast %cst_19 : f32 to vector<8x32xf32>
    %30 = arith.addf %29, %28 : vector<8x32xf32>
    %31 = arith.divf %29, %30 : vector<8x32xf32>
    %32 = vector.extract_strided_slice %14 {offsets = [0, 32], sizes = [8, 32], strides = [1, 1]} : vector<8x128xf32> to vector<8x32xf32>
    %33 = vector.extract_strided_slice %19 {offsets = [0, 32], sizes = [8, 32], strides = [1, 1]} : vector<8x128xf32> to vector<8x32xf32>
    %34 = arith.addf %32, %33 : vector<8x32xf32>
    %35 = arith.negf %34 : vector<8x32xf32>
    %36 = math.exp %35 : vector<8x32xf32>
    %cst_20 = arith.constant 1.000000e+00 : f32
    %37 = vector.broadcast %cst_20 : f32 to vector<8x32xf32>
    %38 = arith.addf %37, %36 : vector<8x32xf32>
    %39 = arith.divf %37, %38 : vector<8x32xf32>
    %40 = vector.extract_strided_slice %14 {offsets = [0, 64], sizes = [8, 32], strides = [1, 1]} : vector<8x128xf32> to vector<8x32xf32>
    %41 = vector.extract_strided_slice %19 {offsets = [0, 64], sizes = [8, 32], strides = [1, 1]} : vector<8x128xf32> to vector<8x32xf32>
    %42 = arith.mulf %31, %41 : vector<8x32xf32>
    %43 = arith.addf %40, %42 : vector<8x32xf32>
    %44 = math.tanh %43 : vector<8x32xf32>
    %cst_21 = arith.constant 1.000000e+00 : f32
    %45 = vector.broadcast %cst_21 : f32 to vector<8x32xf32>
    %46 = arith.subf %45, %39 : vector<8x32xf32>
    %47 = arith.mulf %46, %44 : vector<8x32xf32>
    %48 = arith.mulf %39, %10 : vector<8x32xf32>
    %49 = arith.addf %47, %48 : vector<8x32xf32>
    %50 = vector.extract_strided_slice %15 {offsets = [0, 0], sizes = [8, 32], strides = [1, 1]} : vector<8x128xf32> to vector<8x32xf32>
    %51 = vector.extract_strided_slice %23 {offsets = [0, 0], sizes = [8, 32], strides = [1, 1]} : vector<8x128xf32> to vector<8x32xf32>
    %52 = arith.addf %50, %51 : vector<8x32xf32>
    %53 = arith.negf %52 : vector<8x32xf32>
    %54 = math.exp %53 : vector<8x32xf32>
    %cst_22 = arith.constant 1.000000e+00 : f32
    %55 = vector.broadcast %cst_22 : f32 to vector<8x32xf32>
    %56 = arith.addf %55, %54 : vector<8x32xf32>
    %57 = arith.divf %55, %56 : vector<8x32xf32>
    %58 = vector.extract_strided_slice %15 {offsets = [0, 32], sizes = [8, 32], strides = [1, 1]} : vector<8x128xf32> to vector<8x32xf32>
    %59 = vector.extract_strided_slice %23 {offsets = [0, 32], sizes = [8, 32], strides = [1, 1]} : vector<8x128xf32> to vector<8x32xf32>
    %60 = arith.addf %58, %59 : vector<8x32xf32>
    %61 = arith.negf %60 : vector<8x32xf32>
    %62 = math.exp %61 : vector<8x32xf32>
    %cst_23 = arith.constant 1.000000e+00 : f32
    %63 = vector.broadcast %cst_23 : f32 to vector<8x32xf32>
    %64 = arith.addf %63, %62 : vector<8x32xf32>
    %65 = arith.divf %63, %64 : vector<8x32xf32>
    %66 = vector.extract_strided_slice %15 {offsets = [0, 64], sizes = [8, 32], strides = [1, 1]} : vector<8x128xf32> to vector<8x32xf32>
    %67 = vector.extract_strided_slice %23 {offsets = [0, 64], sizes = [8, 32], strides = [1, 1]} : vector<8x128xf32> to vector<8x32xf32>
    %68 = arith.mulf %57, %67 : vector<8x32xf32>
    %69 = arith.addf %66, %68 : vector<8x32xf32>
    %70 = math.tanh %69 : vector<8x32xf32>
    %cst_24 = arith.constant 1.000000e+00 : f32
    %71 = vector.broadcast %cst_24 : f32 to vector<8x32xf32>
    %72 = arith.subf %71, %65 : vector<8x32xf32>
    %73 = arith.mulf %72, %70 : vector<8x32xf32>
    %74 = arith.mulf %65, %11 : vector<8x32xf32>
    %75 = arith.addf %73, %74 : vector<8x32xf32>
    %c0_25 = arith.constant 0 : index
    %c0_26 = arith.constant 0 : index
    %76 = vector.load %arg1[%c0_25, %c0_26] : memref<32x1xf32, #tpu.memory_space<vmem>>, vector<8x1xf32>
    %cst_27 = arith.constant 0.000000e+00 : f32
    %77 = vector.broadcast %cst_27 : f32 to vector<8x1xf32>
    %78 = arith.cmpf ogt, %76, %77 : vector<8x1xf32>
    %c24 = arith.constant 24 : index
    %c0_28 = arith.constant 0 : index
    %79 = vector.load %arg1[%c24, %c0_28] : memref<32x1xf32, #tpu.memory_space<vmem>>, vector<8x1xf32>
    %cst_29 = arith.constant 0.000000e+00 : f32
    %80 = vector.broadcast %cst_29 : f32 to vector<8x1xf32>
    %81 = arith.cmpf ogt, %79, %80 : vector<8x1xf32>
    %82 = vector.shape_cast %78 : vector<8x1xi1> to vector<8x1xi1>
    %83 = vector.broadcast %82 : vector<8x1xi1> to vector<8x32xi1>
    %84 = arith.select %83, %49, %10 : vector<8x32xi1>, vector<8x32xf32>
    %85 = vector.shape_cast %81 : vector<8x1xi1> to vector<8x1xi1>
    %86 = vector.broadcast %85 : vector<8x1xi1> to vector<8x32xi1>
    %87 = arith.select %86, %75, %11 : vector<8x32xi1>, vector<8x32xf32>
    %cst_30 = arith.constant -1.000000e+09 : f32
    %88 = vector.shape_cast %78 : vector<8x1xi1> to vector<8x1xi1>
    %89 = vector.broadcast %88 : vector<8x1xi1> to vector<8x32xi1>
    %90 = vector.broadcast %cst_30 : f32 to vector<8x32xf32>
    %91 = arith.select %89, %84, %90 : vector<8x32xi1>, vector<8x32xf32>
    %92 = arith.maximumf %12, %91 : vector<8x32xf32>
    %cst_31 = arith.constant -1.000000e+09 : f32
    %93 = vector.shape_cast %81 : vector<8x1xi1> to vector<8x1xi1>
    %94 = vector.broadcast %93 : vector<8x1xi1> to vector<8x32xi1>
    %95 = vector.broadcast %cst_31 : f32 to vector<8x32xf32>
    %96 = arith.select %94, %87, %95 : vector<8x32xi1>, vector<8x32xf32>
    %97 = arith.maximumf %13, %96 : vector<8x32xf32>
    %98 = vector.extract_strided_slice %5 {offsets = [8, 0], sizes = [8, 128], strides = [1, 1]} : vector<32x256xf32> to vector<8x128xf32>
    %99 = vector.extract_strided_slice %5 {offsets = [16, 128], sizes = [8, 128], strides = [1, 1]} : vector<32x256xf32> to vector<8x128xf32>
    %100 = arith.truncf %84 : vector<8x32xf32> to vector<8x32xbf16>
    %cst_32 = arith.constant dense<0.000000e+00> : vector<8x128xf32>
    %101 = tpu.matmul %100, %6, %cst_32 {dimension_numbers = #tpu.dot_dimension_numbers<[1], [0], [0], [1], [0, 0, 1, 1], [], []>} : vector<8x32xbf16>, vector<32x128xbf16>, vector<8x128xf32> -> vector<8x128xf32>
    %102 = vector.broadcast %8 : vector<1x128xf32> to vector<8x128xf32>
    %103 = arith.addf %101, %102 : vector<8x128xf32>
    %104 = arith.truncf %87 : vector<8x32xf32> to vector<8x32xbf16>
    %cst_33 = arith.constant dense<0.000000e+00> : vector<8x128xf32>
    %105 = tpu.matmul %104, %7, %cst_33 {dimension_numbers = #tpu.dot_dimension_numbers<[1], [0], [0], [1], [0, 0, 1, 1], [], []>} : vector<8x32xbf16>, vector<32x128xbf16>, vector<8x128xf32> -> vector<8x128xf32>
    %106 = vector.broadcast %9 : vector<1x128xf32> to vector<8x128xf32>
    %107 = arith.addf %105, %106 : vector<8x128xf32>
    %108 = vector.extract_strided_slice %98 {offsets = [0, 0], sizes = [8, 32], strides = [1, 1]} : vector<8x128xf32> to vector<8x32xf32>
    %109 = vector.extract_strided_slice %103 {offsets = [0, 0], sizes = [8, 32], strides = [1, 1]} : vector<8x128xf32> to vector<8x32xf32>
    %110 = arith.addf %108, %109 : vector<8x32xf32>
    %111 = arith.negf %110 : vector<8x32xf32>
    %112 = math.exp %111 : vector<8x32xf32>
    %cst_34 = arith.constant 1.000000e+00 : f32
    %113 = vector.broadcast %cst_34 : f32 to vector<8x32xf32>
    %114 = arith.addf %113, %112 : vector<8x32xf32>
    %115 = arith.divf %113, %114 : vector<8x32xf32>
    %116 = vector.extract_strided_slice %98 {offsets = [0, 32], sizes = [8, 32], strides = [1, 1]} : vector<8x128xf32> to vector<8x32xf32>
    %117 = vector.extract_strided_slice %103 {offsets = [0, 32], sizes = [8, 32], strides = [1, 1]} : vector<8x128xf32> to vector<8x32xf32>
    %118 = arith.addf %116, %117 : vector<8x32xf32>
    %119 = arith.negf %118 : vector<8x32xf32>
    %120 = math.exp %119 : vector<8x32xf32>
    %cst_35 = arith.constant 1.000000e+00 : f32
    %121 = vector.broadcast %cst_35 : f32 to vector<8x32xf32>
    %122 = arith.addf %121, %120 : vector<8x32xf32>
    %123 = arith.divf %121, %122 : vector<8x32xf32>
    %124 = vector.extract_strided_slice %98 {offsets = [0, 64], sizes = [8, 32], strides = [1, 1]} : vector<8x128xf32> to vector<8x32xf32>
    %125 = vector.extract_strided_slice %103 {offsets = [0, 64], sizes = [8, 32], strides = [1, 1]} : vector<8x128xf32> to vector<8x32xf32>
    %126 = arith.mulf %115, %125 : vector<8x32xf32>
    %127 = arith.addf %124, %126 : vector<8x32xf32>
    %128 = math.tanh %127 : vector<8x32xf32>
    %cst_36 = arith.constant 1.000000e+00 : f32
    %129 = vector.broadcast %cst_36 : f32 to vector<8x32xf32>
    %130 = arith.subf %129, %123 : vector<8x32xf32>
    %131 = arith.mulf %130, %128 : vector<8x32xf32>
    %132 = arith.mulf %123, %84 : vector<8x32xf32>
    %133 = arith.addf %131, %132 : vector<8x32xf32>
    %134 = vector.extract_strided_slice %99 {offsets = [0, 0], sizes = [8, 32], strides = [1, 1]} : vector<8x128xf32> to vector<8x32xf32>
    %135 = vector.extract_strided_slice %107 {offsets = [0, 0], sizes = [8, 32], strides = [1, 1]} : vector<8x128xf32> to vector<8x32xf32>
    %136 = arith.addf %134, %135 : vector<8x32xf32>
    %137 = arith.negf %136 : vector<8x32xf32>
    %138 = math.exp %137 : vector<8x32xf32>
    %cst_37 = arith.constant 1.000000e+00 : f32
    %139 = vector.broadcast %cst_37 : f32 to vector<8x32xf32>
    %140 = arith.addf %139, %138 : vector<8x32xf32>
    %141 = arith.divf %139, %140 : vector<8x32xf32>
    %142 = vector.extract_strided_slice %99 {offsets = [0, 32], sizes = [8, 32], strides = [1, 1]} : vector<8x128xf32> to vector<8x32xf32>
    %143 = vector.extract_strided_slice %107 {offsets = [0, 32], sizes = [8, 32], strides = [1, 1]} : vector<8x128xf32> to vector<8x32xf32>
    %144 = arith.addf %142, %143 : vector<8x32xf32>
    %145 = arith.negf %144 : vector<8x32xf32>
    %146 = math.exp %145 : vector<8x32xf32>
    %cst_38 = arith.constant 1.000000e+00 : f32
    %147 = vector.broadcast %cst_38 : f32 to vector<8x32xf32>
    %148 = arith.addf %147, %146 : vector<8x32xf32>
    %149 = arith.divf %147, %148 : vector<8x32xf32>
    %150 = vector.extract_strided_slice %99 {offsets = [0, 64], sizes = [8, 32], strides = [1, 1]} : vector<8x128xf32> to vector<8x32xf32>
    %151 = vector.extract_strided_slice %107 {offsets = [0, 64], sizes = [8, 32], strides = [1, 1]} : vector<8x128xf32> to vector<8x32xf32>
    %152 = arith.mulf %141, %151 : vector<8x32xf32>
    %153 = arith.addf %150, %152 : vector<8x32xf32>
    %154 = math.tanh %153 : vector<8x32xf32>
    %cst_39 = arith.constant 1.000000e+00 : f32
    %155 = vector.broadcast %cst_39 : f32 to vector<8x32xf32>
    %156 = arith.subf %155, %149 : vector<8x32xf32>
    %157 = arith.mulf %156, %154 : vector<8x32xf32>
    %158 = arith.mulf %149, %87 : vector<8x32xf32>
    %159 = arith.addf %157, %158 : vector<8x32xf32>
    %c8 = arith.constant 8 : index
    %c0_40 = arith.constant 0 : index
    %160 = vector.load %arg1[%c8, %c0_40] : memref<32x1xf32, #tpu.memory_space<vmem>>, vector<8x1xf32>
    %cst_41 = arith.constant 0.000000e+00 : f32
    %161 = vector.broadcast %cst_41 : f32 to vector<8x1xf32>
    %162 = arith.cmpf ogt, %160, %161 : vector<8x1xf32>
    %c16 = arith.constant 16 : index
    %c0_42 = arith.constant 0 : index
    %163 = vector.load %arg1[%c16, %c0_42] : memref<32x1xf32, #tpu.memory_space<vmem>>, vector<8x1xf32>
    %cst_43 = arith.constant 0.000000e+00 : f32
    %164 = vector.broadcast %cst_43 : f32 to vector<8x1xf32>
    %165 = arith.cmpf ogt, %163, %164 : vector<8x1xf32>
    %166 = vector.shape_cast %162 : vector<8x1xi1> to vector<8x1xi1>
    %167 = vector.broadcast %166 : vector<8x1xi1> to vector<8x32xi1>
    %168 = arith.select %167, %133, %84 : vector<8x32xi1>, vector<8x32xf32>
    %169 = vector.shape_cast %165 : vector<8x1xi1> to vector<8x1xi1>
    %170 = vector.broadcast %169 : vector<8x1xi1> to vector<8x32xi1>
    %171 = arith.select %170, %159, %87 : vector<8x32xi1>, vector<8x32xf32>
    %cst_44 = arith.constant -1.000000e+09 : f32
    %172 = vector.shape_cast %162 : vector<8x1xi1> to vector<8x1xi1>
    %173 = vector.broadcast %172 : vector<8x1xi1> to vector<8x32xi1>
    %174 = vector.broadcast %cst_44 : f32 to vector<8x32xf32>
    %175 = arith.select %173, %168, %174 : vector<8x32xi1>, vector<8x32xf32>
    %176 = arith.maximumf %92, %175 : vector<8x32xf32>
    %cst_45 = arith.constant -1.000000e+09 : f32
    %177 = vector.shape_cast %165 : vector<8x1xi1> to vector<8x1xi1>
    %178 = vector.broadcast %177 : vector<8x1xi1> to vector<8x32xi1>
    %179 = vector.broadcast %cst_45 : f32 to vector<8x32xf32>
    %180 = arith.select %178, %171, %179 : vector<8x32xi1>, vector<8x32xf32>
    %181 = arith.maximumf %97, %180 : vector<8x32xf32>
    %182 = vector.extract_strided_slice %5 {offsets = [16, 0], sizes = [8, 128], strides = [1, 1]} : vector<32x256xf32> to vector<8x128xf32>
    %183 = vector.extract_strided_slice %5 {offsets = [8, 128], sizes = [8, 128], strides = [1, 1]} : vector<32x256xf32> to vector<8x128xf32>
    %184 = arith.truncf %168 : vector<8x32xf32> to vector<8x32xbf16>
    %cst_46 = arith.constant dense<0.000000e+00> : vector<8x128xf32>
    %185 = tpu.matmul %184, %6, %cst_46 {dimension_numbers = #tpu.dot_dimension_numbers<[1], [0], [0], [1], [0, 0, 1, 1], [], []>} : vector<8x32xbf16>, vector<32x128xbf16>, vector<8x128xf32> -> vector<8x128xf32>
    %186 = vector.broadcast %8 : vector<1x128xf32> to vector<8x128xf32>
    %187 = arith.addf %185, %186 : vector<8x128xf32>
    %188 = arith.truncf %171 : vector<8x32xf32> to vector<8x32xbf16>
    %cst_47 = arith.constant dense<0.000000e+00> : vector<8x128xf32>
    %189 = tpu.matmul %188, %7, %cst_47 {dimension_numbers = #tpu.dot_dimension_numbers<[1], [0], [0], [1], [0, 0, 1, 1], [], []>} : vector<8x32xbf16>, vector<32x128xbf16>, vector<8x128xf32> -> vector<8x128xf32>
    %190 = vector.broadcast %9 : vector<1x128xf32> to vector<8x128xf32>
    %191 = arith.addf %189, %190 : vector<8x128xf32>
    %192 = vector.extract_strided_slice %182 {offsets = [0, 0], sizes = [8, 32], strides = [1, 1]} : vector<8x128xf32> to vector<8x32xf32>
    %193 = vector.extract_strided_slice %187 {offsets = [0, 0], sizes = [8, 32], strides = [1, 1]} : vector<8x128xf32> to vector<8x32xf32>
    %194 = arith.addf %192, %193 : vector<8x32xf32>
    %195 = arith.negf %194 : vector<8x32xf32>
    %196 = math.exp %195 : vector<8x32xf32>
    %cst_48 = arith.constant 1.000000e+00 : f32
    %197 = vector.broadcast %cst_48 : f32 to vector<8x32xf32>
    %198 = arith.addf %197, %196 : vector<8x32xf32>
    %199 = arith.divf %197, %198 : vector<8x32xf32>
    %200 = vector.extract_strided_slice %182 {offsets = [0, 32], sizes = [8, 32], strides = [1, 1]} : vector<8x128xf32> to vector<8x32xf32>
    %201 = vector.extract_strided_slice %187 {offsets = [0, 32], sizes = [8, 32], strides = [1, 1]} : vector<8x128xf32> to vector<8x32xf32>
    %202 = arith.addf %200, %201 : vector<8x32xf32>
    %203 = arith.negf %202 : vector<8x32xf32>
    %204 = math.exp %203 : vector<8x32xf32>
    %cst_49 = arith.constant 1.000000e+00 : f32
    %205 = vector.broadcast %cst_49 : f32 to vector<8x32xf32>
    %206 = arith.addf %205, %204 : vector<8x32xf32>
    %207 = arith.divf %205, %206 : vector<8x32xf32>
    %208 = vector.extract_strided_slice %182 {offsets = [0, 64], sizes = [8, 32], strides = [1, 1]} : vector<8x128xf32> to vector<8x32xf32>
    %209 = vector.extract_strided_slice %187 {offsets = [0, 64], sizes = [8, 32], strides = [1, 1]} : vector<8x128xf32> to vector<8x32xf32>
    %210 = arith.mulf %199, %209 : vector<8x32xf32>
    %211 = arith.addf %208, %210 : vector<8x32xf32>
    %212 = math.tanh %211 : vector<8x32xf32>
    %cst_50 = arith.constant 1.000000e+00 : f32
    %213 = vector.broadcast %cst_50 : f32 to vector<8x32xf32>
    %214 = arith.subf %213, %207 : vector<8x32xf32>
    %215 = arith.mulf %214, %212 : vector<8x32xf32>
    %216 = arith.mulf %207, %168 : vector<8x32xf32>
    %217 = arith.addf %215, %216 : vector<8x32xf32>
    %218 = vector.extract_strided_slice %183 {offsets = [0, 0], sizes = [8, 32], strides = [1, 1]} : vector<8x128xf32> to vector<8x32xf32>
    %219 = vector.extract_strided_slice %191 {offsets = [0, 0], sizes = [8, 32], strides = [1, 1]} : vector<8x128xf32> to vector<8x32xf32>
    %220 = arith.addf %218, %219 : vector<8x32xf32>
    %221 = arith.negf %220 : vector<8x32xf32>
    %222 = math.exp %221 : vector<8x32xf32>
    %cst_51 = arith.constant 1.000000e+00 : f32
    %223 = vector.broadcast %cst_51 : f32 to vector<8x32xf32>
    %224 = arith.addf %223, %222 : vector<8x32xf32>
    %225 = arith.divf %223, %224 : vector<8x32xf32>
    %226 = vector.extract_strided_slice %183 {offsets = [0, 32], sizes = [8, 32], strides = [1, 1]} : vector<8x128xf32> to vector<8x32xf32>
    %227 = vector.extract_strided_slice %191 {offsets = [0, 32], sizes = [8, 32], strides = [1, 1]} : vector<8x128xf32> to vector<8x32xf32>
    %228 = arith.addf %226, %227 : vector<8x32xf32>
    %229 = arith.negf %228 : vector<8x32xf32>
    %230 = math.exp %229 : vector<8x32xf32>
    %cst_52 = arith.constant 1.000000e+00 : f32
    %231 = vector.broadcast %cst_52 : f32 to vector<8x32xf32>
    %232 = arith.addf %231, %230 : vector<8x32xf32>
    %233 = arith.divf %231, %232 : vector<8x32xf32>
    %234 = vector.extract_strided_slice %183 {offsets = [0, 64], sizes = [8, 32], strides = [1, 1]} : vector<8x128xf32> to vector<8x32xf32>
    %235 = vector.extract_strided_slice %191 {offsets = [0, 64], sizes = [8, 32], strides = [1, 1]} : vector<8x128xf32> to vector<8x32xf32>
    %236 = arith.mulf %225, %235 : vector<8x32xf32>
    %237 = arith.addf %234, %236 : vector<8x32xf32>
    %238 = math.tanh %237 : vector<8x32xf32>
    %cst_53 = arith.constant 1.000000e+00 : f32
    %239 = vector.broadcast %cst_53 : f32 to vector<8x32xf32>
    %240 = arith.subf %239, %233 : vector<8x32xf32>
    %241 = arith.mulf %240, %238 : vector<8x32xf32>
    %242 = arith.mulf %233, %171 : vector<8x32xf32>
    %243 = arith.addf %241, %242 : vector<8x32xf32>
    %c16_54 = arith.constant 16 : index
    %c0_55 = arith.constant 0 : index
    %244 = vector.load %arg1[%c16_54, %c0_55] : memref<32x1xf32, #tpu.memory_space<vmem>>, vector<8x1xf32>
    %cst_56 = arith.constant 0.000000e+00 : f32
    %245 = vector.broadcast %cst_56 : f32 to vector<8x1xf32>
    %246 = arith.cmpf ogt, %244, %245 : vector<8x1xf32>
    %c8_57 = arith.constant 8 : index
    %c0_58 = arith.constant 0 : index
    %247 = vector.load %arg1[%c8_57, %c0_58] : memref<32x1xf32, #tpu.memory_space<vmem>>, vector<8x1xf32>
    %cst_59 = arith.constant 0.000000e+00 : f32
    %248 = vector.broadcast %cst_59 : f32 to vector<8x1xf32>
    %249 = arith.cmpf ogt, %247, %248 : vector<8x1xf32>
    %250 = vector.shape_cast %246 : vector<8x1xi1> to vector<8x1xi1>
    %251 = vector.broadcast %250 : vector<8x1xi1> to vector<8x32xi1>
    %252 = arith.select %251, %217, %168 : vector<8x32xi1>, vector<8x32xf32>
    %253 = vector.shape_cast %249 : vector<8x1xi1> to vector<8x1xi1>
    %254 = vector.broadcast %253 : vector<8x1xi1> to vector<8x32xi1>
    %255 = arith.select %254, %243, %171 : vector<8x32xi1>, vector<8x32xf32>
    %cst_60 = arith.constant -1.000000e+09 : f32
    %256 = vector.shape_cast %246 : vector<8x1xi1> to vector<8x1xi1>
    %257 = vector.broadcast %256 : vector<8x1xi1> to vector<8x32xi1>
    %258 = vector.broadcast %cst_60 : f32 to vector<8x32xf32>
    %259 = arith.select %257, %252, %258 : vector<8x32xi1>, vector<8x32xf32>
    %260 = arith.maximumf %176, %259 : vector<8x32xf32>
    %cst_61 = arith.constant -1.000000e+09 : f32
    %261 = vector.shape_cast %249 : vector<8x1xi1> to vector<8x1xi1>
    %262 = vector.broadcast %261 : vector<8x1xi1> to vector<8x32xi1>
    %263 = vector.broadcast %cst_61 : f32 to vector<8x32xf32>
    %264 = arith.select %262, %255, %263 : vector<8x32xi1>, vector<8x32xf32>
    %265 = arith.maximumf %181, %264 : vector<8x32xf32>
    %266 = vector.extract_strided_slice %5 {offsets = [24, 0], sizes = [8, 128], strides = [1, 1]} : vector<32x256xf32> to vector<8x128xf32>
    %267 = vector.extract_strided_slice %5 {offsets = [0, 128], sizes = [8, 128], strides = [1, 1]} : vector<32x256xf32> to vector<8x128xf32>
    %268 = arith.truncf %252 : vector<8x32xf32> to vector<8x32xbf16>
    %cst_62 = arith.constant dense<0.000000e+00> : vector<8x128xf32>
    %269 = tpu.matmul %268, %6, %cst_62 {dimension_numbers = #tpu.dot_dimension_numbers<[1], [0], [0], [1], [0, 0, 1, 1], [], []>} : vector<8x32xbf16>, vector<32x128xbf16>, vector<8x128xf32> -> vector<8x128xf32>
    %270 = vector.broadcast %8 : vector<1x128xf32> to vector<8x128xf32>
    %271 = arith.addf %269, %270 : vector<8x128xf32>
    %272 = arith.truncf %255 : vector<8x32xf32> to vector<8x32xbf16>
    %cst_63 = arith.constant dense<0.000000e+00> : vector<8x128xf32>
    %273 = tpu.matmul %272, %7, %cst_63 {dimension_numbers = #tpu.dot_dimension_numbers<[1], [0], [0], [1], [0, 0, 1, 1], [], []>} : vector<8x32xbf16>, vector<32x128xbf16>, vector<8x128xf32> -> vector<8x128xf32>
    %274 = vector.broadcast %9 : vector<1x128xf32> to vector<8x128xf32>
    %275 = arith.addf %273, %274 : vector<8x128xf32>
    %276 = vector.extract_strided_slice %266 {offsets = [0, 0], sizes = [8, 32], strides = [1, 1]} : vector<8x128xf32> to vector<8x32xf32>
    %277 = vector.extract_strided_slice %271 {offsets = [0, 0], sizes = [8, 32], strides = [1, 1]} : vector<8x128xf32> to vector<8x32xf32>
    %278 = arith.addf %276, %277 : vector<8x32xf32>
    %279 = arith.negf %278 : vector<8x32xf32>
    %280 = math.exp %279 : vector<8x32xf32>
    %cst_64 = arith.constant 1.000000e+00 : f32
    %281 = vector.broadcast %cst_64 : f32 to vector<8x32xf32>
    %282 = arith.addf %281, %280 : vector<8x32xf32>
    %283 = arith.divf %281, %282 : vector<8x32xf32>
    %284 = vector.extract_strided_slice %266 {offsets = [0, 32], sizes = [8, 32], strides = [1, 1]} : vector<8x128xf32> to vector<8x32xf32>
    %285 = vector.extract_strided_slice %271 {offsets = [0, 32], sizes = [8, 32], strides = [1, 1]} : vector<8x128xf32> to vector<8x32xf32>
    %286 = arith.addf %284, %285 : vector<8x32xf32>
    %287 = arith.negf %286 : vector<8x32xf32>
    %288 = math.exp %287 : vector<8x32xf32>
    %cst_65 = arith.constant 1.000000e+00 : f32
    %289 = vector.broadcast %cst_65 : f32 to vector<8x32xf32>
    %290 = arith.addf %289, %288 : vector<8x32xf32>
    %291 = arith.divf %289, %290 : vector<8x32xf32>
    %292 = vector.extract_strided_slice %266 {offsets = [0, 64], sizes = [8, 32], strides = [1, 1]} : vector<8x128xf32> to vector<8x32xf32>
    %293 = vector.extract_strided_slice %271 {offsets = [0, 64], sizes = [8, 32], strides = [1, 1]} : vector<8x128xf32> to vector<8x32xf32>
    %294 = arith.mulf %283, %293 : vector<8x32xf32>
    %295 = arith.addf %292, %294 : vector<8x32xf32>
    %296 = math.tanh %295 : vector<8x32xf32>
    %cst_66 = arith.constant 1.000000e+00 : f32
    %297 = vector.broadcast %cst_66 : f32 to vector<8x32xf32>
    %298 = arith.subf %297, %291 : vector<8x32xf32>
    %299 = arith.mulf %298, %296 : vector<8x32xf32>
    %300 = arith.mulf %291, %252 : vector<8x32xf32>
    %301 = arith.addf %299, %300 : vector<8x32xf32>
    %302 = vector.extract_strided_slice %267 {offsets = [0, 0], sizes = [8, 32], strides = [1, 1]} : vector<8x128xf32> to vector<8x32xf32>
    %303 = vector.extract_strided_slice %275 {offsets = [0, 0], sizes = [8, 32], strides = [1, 1]} : vector<8x128xf32> to vector<8x32xf32>
    %304 = arith.addf %302, %303 : vector<8x32xf32>
    %305 = arith.negf %304 : vector<8x32xf32>
    %306 = math.exp %305 : vector<8x32xf32>
    %cst_67 = arith.constant 1.000000e+00 : f32
    %307 = vector.broadcast %cst_67 : f32 to vector<8x32xf32>
    %308 = arith.addf %307, %306 : vector<8x32xf32>
    %309 = arith.divf %307, %308 : vector<8x32xf32>
    %310 = vector.extract_strided_slice %267 {offsets = [0, 32], sizes = [8, 32], strides = [1, 1]} : vector<8x128xf32> to vector<8x32xf32>
    %311 = vector.extract_strided_slice %275 {offsets = [0, 32], sizes = [8, 32], strides = [1, 1]} : vector<8x128xf32> to vector<8x32xf32>
    %312 = arith.addf %310, %311 : vector<8x32xf32>
    %313 = arith.negf %312 : vector<8x32xf32>
    %314 = math.exp %313 : vector<8x32xf32>
    %cst_68 = arith.constant 1.000000e+00 : f32
    %315 = vector.broadcast %cst_68 : f32 to vector<8x32xf32>
    %316 = arith.addf %315, %314 : vector<8x32xf32>
    %317 = arith.divf %315, %316 : vector<8x32xf32>
    %318 = vector.extract_strided_slice %267 {offsets = [0, 64], sizes = [8, 32], strides = [1, 1]} : vector<8x128xf32> to vector<8x32xf32>
    %319 = vector.extract_strided_slice %275 {offsets = [0, 64], sizes = [8, 32], strides = [1, 1]} : vector<8x128xf32> to vector<8x32xf32>
    %320 = arith.mulf %309, %319 : vector<8x32xf32>
    %321 = arith.addf %318, %320 : vector<8x32xf32>
    %322 = math.tanh %321 : vector<8x32xf32>
    %cst_69 = arith.constant 1.000000e+00 : f32
    %323 = vector.broadcast %cst_69 : f32 to vector<8x32xf32>
    %324 = arith.subf %323, %317 : vector<8x32xf32>
    %325 = arith.mulf %324, %322 : vector<8x32xf32>
    %326 = arith.mulf %317, %255 : vector<8x32xf32>
    %327 = arith.addf %325, %326 : vector<8x32xf32>
    %c24_70 = arith.constant 24 : index
    %c0_71 = arith.constant 0 : index
    %328 = vector.load %arg1[%c24_70, %c0_71] : memref<32x1xf32, #tpu.memory_space<vmem>>, vector<8x1xf32>
    %cst_72 = arith.constant 0.000000e+00 : f32
    %329 = vector.broadcast %cst_72 : f32 to vector<8x1xf32>
    %330 = arith.cmpf ogt, %328, %329 : vector<8x1xf32>
    %c0_73 = arith.constant 0 : index
    %c0_74 = arith.constant 0 : index
    %331 = vector.load %arg1[%c0_73, %c0_74] : memref<32x1xf32, #tpu.memory_space<vmem>>, vector<8x1xf32>
    %cst_75 = arith.constant 0.000000e+00 : f32
    %332 = vector.broadcast %cst_75 : f32 to vector<8x1xf32>
    %333 = arith.cmpf ogt, %331, %332 : vector<8x1xf32>
    %334 = vector.shape_cast %330 : vector<8x1xi1> to vector<8x1xi1>
    %335 = vector.broadcast %334 : vector<8x1xi1> to vector<8x32xi1>
    %336 = arith.select %335, %301, %252 : vector<8x32xi1>, vector<8x32xf32>
    %337 = vector.shape_cast %333 : vector<8x1xi1> to vector<8x1xi1>
    %338 = vector.broadcast %337 : vector<8x1xi1> to vector<8x32xi1>
    %339 = arith.select %338, %327, %255 : vector<8x32xi1>, vector<8x32xf32>
    %cst_76 = arith.constant -1.000000e+09 : f32
    %340 = vector.shape_cast %330 : vector<8x1xi1> to vector<8x1xi1>
    %341 = vector.broadcast %340 : vector<8x1xi1> to vector<8x32xi1>
    %342 = vector.broadcast %cst_76 : f32 to vector<8x32xf32>
    %343 = arith.select %341, %336, %342 : vector<8x32xi1>, vector<8x32xf32>
    %344 = arith.maximumf %260, %343 : vector<8x32xf32>
    %cst_77 = arith.constant -1.000000e+09 : f32
    %345 = vector.shape_cast %333 : vector<8x1xi1> to vector<8x1xi1>
    %346 = vector.broadcast %345 : vector<8x1xi1> to vector<8x32xi1>
    %347 = vector.broadcast %cst_77 : f32 to vector<8x32xf32>
    %348 = arith.select %346, %339, %347 : vector<8x32xi1>, vector<8x32xf32>
    %349 = arith.maximumf %265, %348 : vector<8x32xf32>
    %c0_78 = arith.constant 0 : index
    %c0_79 = arith.constant 0 : index
    %350 = vector.load %arg8[%c0_78, %c0_79] : memref<1x32xf32, #tpu.memory_space<vmem>>, vector<1x32xf32>
    %351 = vector.broadcast %350 : vector<1x32xf32> to vector<8x32xf32>
    %352 = arith.mulf %344, %351 : vector<8x32xf32>
    %cst_80 = arith.constant dense<0.000000e+00> : vector<8xf32>
    %353 = vector.multi_reduction <add>, %352, %cst_80 [1] : vector<8x32xf32> to vector<8xf32>
    %354 = vector.shape_cast %353 : vector<8xf32> to vector<8x1xf32>
    %c0_81 = arith.constant 0 : index
    %c0_82 = arith.constant 0 : index
    %355 = vector.load %arg9[%c0_81, %c0_82] : memref<1x32xf32, #tpu.memory_space<vmem>>, vector<1x32xf32>
    %356 = vector.broadcast %355 : vector<1x32xf32> to vector<8x32xf32>
    %357 = arith.mulf %349, %356 : vector<8x32xf32>
    %cst_83 = arith.constant dense<0.000000e+00> : vector<8xf32>
    %358 = vector.multi_reduction <add>, %357, %cst_83 [1] : vector<8x32xf32> to vector<8xf32>
    %359 = vector.shape_cast %358 : vector<8xf32> to vector<8x1xf32>
    %360 = arith.addf %354, %359 : vector<8x1xf32>
    %c0_84 = arith.constant 0 : index
    %c0_85 = arith.constant 0 : index
    %361 = vector.load %arg10[%c0_84, %c0_85] : memref<1x1xf32, #tpu.memory_space<vmem>>, vector<1x1xf32>
    %362 = vector.broadcast %361 : vector<1x1xf32> to vector<8x1xf32>
    %363 = arith.addf %360, %362 : vector<8x1xf32>
    %c0_86 = arith.constant 0 : index
    %c0_87 = arith.constant 0 : index
    %364 = vector.load %arg11[%c0_86, %c0_87] : memref<8x1xf32, #tpu.memory_space<vmem>>, vector<8x1xf32>
    tpu.vector_store %arg11[%c0_86, %c0_87], %363 {strides = array<i32>} : memref<8x1xf32, #tpu.memory_space<vmem>>, vector<8x1xf32>,
    return
  }
}

</mosaic_0001>

<bundles_post_ra>
// kernel: _forward_jit.2
= control target key start
LH: loop header
LB: loop body
LE: loop exit
PB: predicated region body
PF: predicated region fallthrough
CT: control target
= control target key end

     0   :  { %v275_v0 = vmov 0.0   ;;  %vm276_vm0 = vmmov 0   ;;  %vm48_vm1 = vcmask 261120   ;;  %vm99_vm2 = vcmask 130048   ;;  %s343_s1 = inlined_call_operand.vmem [shape: bf16[32,32], index: 1, kind: input, shape index: {}]   ;;  %s344_s0 = inlined_call_operand.vmem [shape: bf16[16,32], index: 0, kind: input, shape index: {}]   ;;  %s345_s3 = inlined_call_operand.vmem [shape: f32[48,16], index: 3, kind: input, shape index: {}]   ;;  %s346_s2 = inlined_call_operand.vmem [shape: f32[1,32], index: 2, kind: input, shape index: {}]   ;;  %s347_s4 = inlined_call_operand.vmem [shape: f32[8,32], index: 4, kind: output, shape index: {}]  }
   0x1   :  { %245 = vmatprep.subr.bf16.mxu0 %v275_v0  ;;  %v272_v1 = vld [vmem:[%s343_s1] sm:$0xff]   ;;  %249 = vmatprep.mubr.msk.bf16.mxu0 %vm276_vm0, %v275_v0  ;;  %v273_v2 = vld [vmem:[%s343_s1 + $0x8] sm:$0xff]   ;;  %v95_v14 = vld [vmem:[%s345_s3 + $0x10] sm:$0xff] }
   0x2   :  { %246 = vmatpush3.bf16.msra.mxu0 %v272_v1  ;;  %v274_v3 = vld [vmem:[%s344_s0] sm:$0xff]   ;;  %v94_v13 = vld [vmem:[%s345_s3 + $0x8] sm:$0xff]  ;;  %v96_v15 = vld [vmem:[%s345_s3 + $0x18] sm:$0xff] }
   0x3   :  { %247 = vmatprep.subr.bf16.mxu0 %v275_v0  ;;  %v93_v4 = vld [vmem:[%s345_s3] sm:$0xff]  ;;  %v98_v17 = vld [vmem:[%s345_s3 + $0x28] sm:$0xff] }
   0x4   :  { %257 = vmatprep.mubr.msk.f32.mxu1 %vm99_vm2, %v93_v4  ;;  %v223_v5 = vld [vmem:[%s346_s2] ss:$0 sm:$0xff] }
   0x5   :  { %v97_v16 = vld [vmem:[%s345_s3 + $0x20] sm:$0xff] }
   0x6   :  { %248 = vmatpush3.bf16.msra.mxu0 %v273_v2 }
   0x9   :  { %250 = vmatmul.mubr.msk.bf16.vlgmr.msra.gmra.mrb[0].mxu0 %vm48_vm1, %v274_v3 }
  0xdc   :  { %v86_v6 = vpop.f32.mrb[0].mxu0 }
  0xdd   :  { %v251_v7 = vpop.f32.mrb[1].mxu0  ;;  %v87_v9 = vadd.f32 %v223_v5, %v86_v6 }
  0xde   :  { %v89_v8 = vpop.f32.mrb[2].mxu0 }
  0xdf   :  { %v90_v10 = vadd.f32 %v223_v5, %v89_v8  ;;  %v252_v11 = vpop.f32.mrb[3].mxu0 }
  0xe1   :  { %v266_v12 = vpack.c.bf16 %v90_v10, %v87_v9 }
  0xe3   :  { %267 = vmatprep.subr.bf16.mxu1 %v266_v12 }
  0xe4   :  { %269 = vmatpush3.bf16.msra.mxu1 %v266_v12 }
  0xe7   :  { %258 = vmatmul.mubr.msk.f32.vlgmr.msra.gmra.mrb[0].mxu1 %vm99_vm2, %v94_v13 }
  0xe8   :  { %260 = vmatprep.mubr.msk.f32.mxu1 %vm99_vm2, %v95_v14 }
  0xeb   :  { %261 = vmatmul.mubr.msk.f32.gmra.mrb[2].mxu1 %vm99_vm2, %v96_v15 }
  0xec   :  { %263 = vmatprep.mubr.msk.f32.mxu1 %vm99_vm2, %v97_v16 }
  0xef   :  { %264 = vmatmul.mubr.msk.f32.gmra.mrb[4].mxu1 %vm99_vm2, %v98_v17 }
 0x1ba   :  { %v259_v18 = vpop.f32.mrb[0].mxu1 }
 0x1bb   :  { %v184_v19 = vpop.f32.mrb[1].mxu1 }
 0x1bc   :  { %v213_v20 = vmax.f32 %v184_v19, %v259_v18 }
 0x1be   :  { %v262_v21 = vpop.f32.mrb[2].mxu1 }
 0x1bf   :  { %v194_v22 = vpop.f32.mrb[3].mxu1 }
 0x1c0   :  { %v214_v23 = vmax.f32 %v213_v20, %v194_v22 }
 0x1c2   :  { %v265_v24 = vpop.f32.mrb[4].mxu1  ;;  %v215_v25 = vmax.f32 %v214_v23, %v262_v21 }
 0x1c3   :  { %v204_v26 = vpop.f32.mrb[5].mxu1 }
 0x1c4   :  { %v216_v27 = vmax.f32 %v215_v25, %v204_v26 }
 0x1c6   :  { %v217_v28 = vmax.f32 %v216_v27, %v265_v24 }
 0x1c8   :  { %218 = vst.msk [vmem:[%s347_s4] sm:$0xff] %vm48_vm1, %v217_v28 }

// kernel: _forward_jit.3
= control target key start
LH: loop header
LB: loop body
LE: loop exit
PB: predicated region body
PF: predicated region fallthrough
CT: control target
= control target key end

     0   :  { %v1056_v0 = vmov 0.0   ;;  %vm1057_vm0 = vmmov 0   ;;  %v1058_v3 = vmov 0   ;;  %vm91_vm1 = vcmask 261120   ;;  %s1059_s18 = smov 64   ;;  %s1060_s22 = smov 96   ;;  %s1429_s2 = inlined_call_operand.vmem [shape: bf16[32,256], index: 2, kind: input, shape index: {}]   ;;  %s1430_s4 = inlined_call_operand.vmem [shape: bf16[32,128], index: 4, kind: input, shape index: {}]   ;;  %s1431_s0 = inlined_call_operand.vmem [shape: bf16[32,32], index: 0, kind: input, shape index: {}]   ;;  %s1432_s5 = inlined_call_operand.vmem [shape: bf16[32,128], index: 5, kind: input, shape index: {}]   ;;  %s1433_s6 = inlined_call_operand.vmem [shape: f32[1,128], index: 6, kind: input, shape index: {}]   ;;  %s1434_s3 = inlined_call_operand.vmem [shape: f32[1,256], index: 3, kind: input, shape index: {}]   ;;  %s1435_s7 = inlined_call_operand.vmem [shape: f32[1,128], index: 7, kind: input, shape index: {}]   ;;  %s1436_s1 = inlined_call_operand.vmem [shape: f32[32,1], index: 1, kind: input, shape index: {}]   ;;  %s1437_s8 = inlined_call_operand.vmem [shape: f32[1,32], index: 8, kind: input, shape index: {}]   ;;  %s1438_s9 = inlined_call_operand.vmem [shape: f32[1,32], index: 9, kind: input, shape index: {}]   ;;  %s1439_s10 = inlined_call_operand.<no memory space> [shape: f32[1,1], index: 10, kind: input, shape index: {}]   ;;  %s1440_s11 = inlined_call_operand.vmem [shape: f32[8,1], index: 11, kind: output, shape index: {}]  }
   0x1   :  { %924 = vmatprep.subr.bf16.mxu1 %v1056_v0  ;;  %v996_v1 = vld [vmem:[%s1429_s2 + $0x4] ss:$8 sps:$4 sm:$0xff]   ;;  %928 = vmatprep.mubr.msk.bf16.mxu1 %vm1057_vm0, %v1056_v0  ;;  %v999_v4 = vld [vmem:[%s1429_s2] ss:$8 sps:$4 sm:$0xff]   ;;  %v1000_v5 = vld [vmem:[%s1429_s2 + $0x14] ss:$8 sps:$4 sm:$0xff]   ;;  %v51_v12 = vlaneseq }
   0x2   :  { %v1131_v2 = vld [vmem:[%s1430_s4] sm:$0xff]   ;;  %130 = vmatprep.mubr.bf16.mxu0 %v1058_v3  ;;  %995 = vset.pattern.permute.xlu1 %v1058_v3  ;;  %v1147_v6 = vld [vmem:[%s1430_s4 + $0x8] sm:$0xff]   ;;  %v1003_v7 = vld [vmem:[%s1429_s2 + $0x10] ss:$8 sps:$4 sm:$0xff]   ;;  %s1061_s28 = smov 32   ;;  %vm863_vm10 = vcmask 7168  }
   0x3   :  { %98 = vmatprep.subr.bf16.mxu0 %v996_v1  ;;  %994 = vset.pattern.permute.xlu0 %v1058_v3  ;;  %v1004_v8 = vld [vmem:[%s1431_s0] sm:$0xff]   ;;  %v1169_v10 = vld [vmem:[%s1432_s5 + $0x8] sm:$0xff]   ;;  %v52_v13 = vshrl.u32 %v51_v12, 7  ;;  %v334_v60 = vld [vmem:[%s1436_s1 + $0x18] sm:$0xff] }
   0x4   :  { %925 = vmatpush3.bf16.msra.mxu1 %v1131_v2  ;;  %99 = vmatpush1.bf16.msra.mxu0 %v999_v4  ;;  %v1159_v9 = vld [vmem:[%s1432_s5] sm:$0xff]   ;;  %v1007_v11 = vld [vmem:[%s1431_s0 + $0x8] sm:$0xff]   ;;  %vm335_vm3 = vcmp.gt.f32.partialorder %v334_v60, 0.0 }
   0x5   :  { %926 = vmatprep.subr.bf16.mxu1 %v1056_v0  ;;  %100 = vmatprep.subr.bf16.mxu0 %v1000_v5  ;;  %v57_v14 = vsub.s32 1, %v52_v13  ;;  %v1197_v15 = vld [vmem:[%s1433_s6] ss:$0 sm:$0xff]  ;;  %v53_v16 = vsub.s32 0, %v52_v13  ;;  %v342_v1 = vsel %vm335_vm3, 1, %v1058_v3 }
   0x6   :  { %v49_v17 = vld [vmem:[%s1434_s3] sm:$0x3] }
   0x7   :  { %v58_v22 = vrot.slane %v49_v17, %v57_v14  ;;  %v54_v23 = vrot.slane %v49_v17, %v53_v16  ;;  %v1213_v32 = vld [vmem:[%s1435_s7] ss:$0 sm:$0xff] }
   0x8   :  { %927 = vmatpush3.bf16.msra.mxu1 %v1147_v6  ;;  %101 = vmatpush1.bf16.msra.mxu0 %v1003_v7  ;;  %v332_v53 = vld [vmem:[%s1436_s1] sm:$0xff] }
   0x9   :  { %932 = vmatprep.subr.bf16.mxu1 %v1056_v0  ;;  %940 = vmatprep.subr.bf16.mxu0 %v1056_v0  ;;  %vm333_vm2 = vcmp.gt.f32.partialorder %v332_v53, 0.0 }
   0xa   :  { %v336_v55 = vsel %vm333_vm2, 1, %v1058_v3 }
   0xb   :  { %929 = vmatmul.mubr.bf16.vlgmr.msra.gmra.mrb[0].mxu1 %v1058_v3  ;;  %875 = vmatmul.mubr.msk.bf16.vlgmr.msra.gmra.mrb[0].mxu0 %vm91_vm1, %v1004_v8 }
   0xc   :  { %933 = vmatpush3.bf16.msra.mxu1 %v1159_v9  ;;  %936 = vmatprep.mubr.msk.bf16.mxu1 %vm1057_vm0, %v1056_v0 }
   0xd   :  { %934 = vmatprep.subr.bf16.mxu1 %v1056_v0  ;;  %140 = vmatprep.mubr.bf16.mxu0 %v1058_v3 }
   0xe   :  { %941 = vmatpush3.bf16.msra.mxu0 %v1131_v2 }
   0xf   :  { %942 = vmatprep.subr.bf16.mxu0 %v1056_v0 }
  0x10   :  { %935 = vmatpush3.bf16.msra.mxu1 %v1169_v10 }
  0x11   :  { %948 = vmatprep.subr.bf16.mxu1 %v1056_v0 }
  0x12   :  { %943 = vmatpush3.bf16.msra.mxu0 %v1147_v6 }
  0x13   :  { %937 = vmatmul.mubr.bf16.vlgmr.msra.gmra.mrb[4].mxu1 %v1058_v3  ;;  %956 = vmatprep.subr.bf16.mxu0 %v1056_v0 }
  0x14   :  { %876 = vmatmul.mubr.msk.bf16.gmra.mrb[4].mxu0 %vm91_vm1, %v1007_v11  ;;  %949 = vmatpush3.bf16.msra.mxu1 %v1159_v9 }
  0x15   :  { %944 = vmatprep.mubr.msk.bf16.mxu0 %vm1057_vm0, %v1056_v0  ;;  %950 = vmatprep.subr.bf16.mxu1 %v1056_v0 }
  0x16   :  { %952 = vmatprep.mubr.msk.bf16.mxu1 %vm1057_vm0, %v1056_v0 }
  0x18   :  { %951 = vmatpush3.bf16.msra.mxu1 %v1169_v10 }
  0x19   :  { %964 = vmatprep.subr.bf16.mxu1 %v1056_v0 }
  0xde   :  { %v216_v18 = vpop.f32.mrb[0].mxu1  ;;  %v132_v20 = vpop.f32.mrb[0].mxu0 }
  0xdf   :  { %v217_v19 = vadd.f32 %v1197_v15, %v216_v18  ;;  %v930_v21 = vpop.f32.mrb[1].mxu1  ;;  %v134_v25 = vpop.f32.mrb[1].mxu0  ;;  %v133_v45 = vadd.f32 %v132_v20, %v54_v23 }
  0xe0   :  { %v219_v24 = vpop.f32.mrb[2].mxu1  ;;  %v1204_v27 = vadd.f32 %v134_v25, %v58_v22  ;;  %v136_v28 = vpop.f32.mrb[2].mxu0 }
  0xe1   :  { %288 = vrot.lane.b32.xlu0 %v217_v19, %s1059_s18  ;;  %v931_v26 = vpop.f32.mrb[3].mxu1  ;;  %v1206_v29 = vadd.f32 %v136_v28, %v54_v23  ;;  %v138_v30 = vpop.f32.mrb[3].mxu0  ;;  %v280_v46 = vadd.f32 %v217_v19, %v133_v45 }
  0xe2   :  { %v1208_v31 = vadd.f32 %v138_v30, %v58_v22 }
  0xe3   :  { %v883_v47 = vmul.f32 -1.442695, %v280_v46 }
  0xe5   :  { %1008 = vpow2.f32 %v883_v47 }
  0xe6   :  { %v274_v33 = vpop.f32.mrb[4].mxu1 }
  0xe7   :  { %v275_v34 = vadd.f32 %v1213_v32, %v274_v33  ;;  %v142_v35 = vpop.f32.mrb[4].mxu0  ;;  %v938_v36 = vpop.f32.mrb[5].mxu1 }
  0xe8   :  { %v1216_v37 = vadd.f32 %v142_v35, %v54_v23  ;;  %v144_v38 = vpop.f32.mrb[5].mxu0  ;;  %v277_v39 = vpop.f32.mrb[6].mxu1 }
  0xe9   :  { %v1218_v40 = vadd.f32 %v144_v38, %v58_v22  ;;  %314 = vrot.lane.b32.xlu0 %v275_v34, %s1059_s18  ;;  %v146_v41 = vpop.f32.mrb[6].mxu0  ;;  %v939_v42 = vpop.f32.mrb[7].mxu1 }
  0xea   :  { %v1221_v43 = vadd.f32 %v146_v41, %v54_v23  ;;  %v148_v44 = vpop.f32.mrb[7].mxu0 }
  0xeb   :  { %v149_v48 = vadd.f32 %v148_v44, %v58_v22 }
  0xed   :  { %v306_v49 = vadd.f32 %v275_v34, %v149_v48  ;;  %338 = vperm.xlu0 %994, %v336_v55  }
  0xef   :  { %v884_v50 = vmul.f32 -1.442695, %v306_v49  ;;  %v1009_v51 = vpop.eup %1008 }
  0xf0   :  { %v284_v52 = vadd.f32 1.0, %v1009_v51 }
  0xf1   :  { %1010 = vpow2.f32 %v884_v50 }
  0xf2   :  { %1012 = vrcp.f32 %v284_v52 }
  0xfb   :  { %v1011_v54 = vpop.eup %1010 }
  0xfc   :  { %v310_v56 = vadd.f32 1.0, %v1011_v54  ;;  %v1013_v57 = vpop.eup %1012 }
  0xfd   :  { %v298_v14 = vsub.f32 1.0, %v1013_v57  ;;  %v304_v18 = vmul.f32 0.0, %v1013_v57 }
  0xfe   :  { %1014 = vrcp.f32 %v310_v56 }
 0x108   :  { %v1015_v61 = vpop.eup %1014 }
 0x109   :  { %v324_v23 = vsub.f32 1.0, %v1015_v61  ;;  %v330_v25 = vmul.f32 0.0, %v1015_v61 }
 0x153   :  { %v289_v58 = vpop.permute.xlu0 %288 }
 0x154   :  { %v291_v59 = vmul.f32 %v1013_v57, %v289_v58  ;;  %v498_v57 = vld [vmem:[%s1436_s1 + $0x8] sm:$0xff] }
 0x155   :  { %vm499_vm6 = vcmp.gt.f32.partialorder %v498_v57, 0.0 }
 0x156   :  { %293 = vrot.lane.b32.xlu1 %v291_v59, %s1059_s18 }
 0x15b   :  { %v315_v62 = vpop.permute.xlu0 %314 }
 0x15c   :  { %v317_v63 = vmul.f32 %v1015_v61, %v315_v62  ;;  %v502_v61 = vsel %vm499_vm6, 1, %v1058_v3  ;;  %v500_v62 = vld [vmem:[%s1436_s1 + $0x10] sm:$0xff] }
 0x15d   :  { %vm501_vm7 = vcmp.gt.f32.partialorder %v500_v62, 0.0 }
 0x15e   :  { %319 = vrot.lane.b32.xlu1 %v317_v63, %s1059_s18 }
 0x162   :  { %344 = vperm.xlu1 %995, %v342_v1  }
 0x16c   :  { %v1237_v16 = vpop.permute.xlu0 %338 }
 0x16d   :  { %vm340_vm4 = vcmp.eq.s32.totalorder %v1237_v16, 1  ;;  %v16_v16 = vstv %s1439_s10 }
 0x16e   :  { %17 = vst [vmem:[#allocation2] sm:$0x1] %v16_v16 }
 0x1c8   :  { %v294_v4 = vpop.permute.xlu1 %293 }
 0x1c9   :  { %v296_v5 = vadd.f32 %v294_v4, %v133_v45 }
 0x1cb   :  { %1016 = vtanh.f32 %v296_v5  ;;  %v508_v5 = vsel %vm501_vm7, 1, %v1058_v3 }
 0x1d0   :  { %v320_v7 = vpop.permute.xlu1 %319 }
 0x1d1   :  { %v322_v8 = vadd.f32 %v320_v7, %v149_v48 }
 0x1d3   :  { %1018 = vtanh.f32 %v322_v8 }
 0x1d5   :  { %v1017_v11 = vpop.eup %1016 }
 0x1d6   :  { %300 = vrot.lane.b32.xlu1 %v1017_v11, %s1060_s22 }
 0x1dd   :  { %v1019_v12 = vpop.eup %1018 }
 0x1de   :  { %326 = vrot.lane.b32.xlu0 %v1019_v12, %s1060_s22 }
 0x1e1   :  { %v1235_v13 = vpop.permute.xlu1 %344 }
 0x1e2   :  { %vm346_vm5 = vcmp.eq.s32.totalorder %v1235_v13, 1 }
 0x248   :  { %v301_v17 = vpop.permute.xlu1 %300 }
 0x249   :  { %v303_v19 = vmul.f32 %v301_v17, %v298_v14 }
 0x24b   :  { %v1240_v20 = vadd.f32 %v304_v18, %v303_v19 }
 0x24d   :  { %v1245_v21 = vsel %vm340_vm4, %v1240_v20, 0.0  ;;  %v348_v3 = vsel %vm340_vm4, %v1240_v20, -1e+09 }
 0x24e   :  { %v352_v22 = vpack.c.bf16 %v1245_v21, %v1245_v21 }
 0x250   :  { %v327_v24 = vpop.permute.xlu0 %326  ;;  %354 = vrot.lane.b32.xlu1 %v352_v22, %s1060_s22 }
 0x251   :  { %v329_v26 = vmul.f32 %v327_v24, %v324_v23 }
 0x253   :  { %v1250_v28 = vadd.f32 %v330_v25, %v329_v26 }
 0x255   :  { %v1256_v30 = vsel %vm346_vm5, %v1250_v28, 0.0 }
 0x256   :  { %v399_v33 = vpack.c.bf16 %v1256_v30, %v1256_v30 }
 0x258   :  { %401 = vrot.lane.b32.xlu0 %v399_v33, %s1060_s22 }
 0x2c2   :  { %v355_v34 = vpop.permute.xlu1 %354 }
 0x2c3   :  { %945 = vmatmul.mubr.msk.bf16.vlgmr.msra.gmra.mrb[8].mxu0 %vm91_vm1, %v355_v34 }
 0x2c4   :  { %957 = vmatpush3.bf16.msra.mxu0 %v1131_v2  ;;  %960 = vmatprep.mubr.msk.bf16.mxu0 %vm1057_vm0, %v1056_v0 }
 0x2c5   :  { %958 = vmatprep.subr.bf16.mxu0 %v1056_v0 }
 0x2c8   :  { %959 = vmatpush3.bf16.msra.mxu0 %v1147_v6 }
 0x2c9   :  { %972 = vmatprep.subr.bf16.mxu0 %v1056_v0 }
 0x2ca   :  { %v402_v35 = vpop.permute.xlu0 %401 }
 0x2cb   :  { %953 = vmatmul.mubr.msk.bf16.vlgmr.msra.gmra.mrb[8].mxu1 %vm91_vm1, %v402_v35 }
 0x2cc   :  { %965 = vmatpush3.bf16.msra.mxu1 %v1159_v9  ;;  %968 = vmatprep.mubr.msk.bf16.mxu1 %vm1057_vm0, %v1056_v0 }
 0x2cd   :  { %966 = vmatprep.subr.bf16.mxu1 %v1056_v0 }
 0x2d0   :  { %967 = vmatpush3.bf16.msra.mxu1 %v1169_v10 }
 0x2d1   :  { %980 = vmatprep.subr.bf16.mxu1 %v1056_v0 }
 0x396   :  { %v393_v36 = vpop.f32.mrb[8].mxu0 }
 0x397   :  { %v394_v38 = vadd.f32 %v1197_v15, %v393_v36  ;;  %v946_v39 = vpop.f32.mrb[9].mxu0 }
 0x398   :  { %v396_v41 = vpop.f32.mrb[10].mxu0 }
 0x399   :  { %454 = vrot.lane.b32.xlu1 %v394_v38, %s1059_s18  ;;  %v947_v42 = vpop.f32.mrb[11].mxu0  ;;  %v446_v49 = vadd.f32 %v394_v38, %v1206_v29  ;;  %v350_v38 = vsel %vm346_vm5, %v1250_v28, -1e+09 }
 0x39b   :  { %v887_v50 = vmul.f32 -1.442695, %v446_v49 }
 0x39d   :  { %1020 = vpow2.f32 %v887_v50 }
 0x39e   :  { %v440_v44 = vpop.f32.mrb[8].mxu1 }
 0x39f   :  { %v441_v45 = vadd.f32 %v1213_v32, %v440_v44  ;;  %v954_v46 = vpop.f32.mrb[9].mxu1  ;;  %v351_v44 = vmax.f32 %v350_v38, -1e+09 }
 0x3a0   :  { %v443_v47 = vpop.f32.mrb[10].mxu1 }
 0x3a1   :  { %480 = vrot.lane.b32.xlu0 %v441_v45, %s1059_s18  ;;  %v955_v48 = vpop.f32.mrb[11].mxu1  ;;  %v472_v51 = vadd.f32 %v441_v45, %v1218_v40 }
 0x3a3   :  { %v888_v52 = vmul.f32 -1.442695, %v472_v51 }
 0x3a5   :  { %1022 = vpow2.f32 %v888_v52 }
 0x3a7   :  { %v1021_v53 = vpop.eup %1020 }
 0x3a8   :  { %v450_v54 = vadd.f32 1.0, %v1021_v53 }
 0x3aa   :  { %1024 = vrcp.f32 %v450_v54 }
 0x3af   :  { %v1023_v55 = vpop.eup %1022 }
 0x3b0   :  { %v476_v56 = vadd.f32 1.0, %v1023_v55 }
 0x3b2   :  { %1026 = vrcp.f32 %v476_v56 }
 0x3b4   :  { %v1025_v58 = vpop.eup %1024 }
 0x3b5   :  { %v464_v19 = vsub.f32 1.0, %v1025_v58 }
 0x3bc   :  { %v1027_v63 = vpop.eup %1026 }
 0x3bd   :  { %v490_v35 = vsub.f32 1.0, %v1027_v63  ;;  %v496_v39 = vmul.f32 %v1027_v63, %v1256_v30 }
 0x40b   :  { %v455_v59 = vpop.permute.xlu1 %454 }
 0x40c   :  { %v457_v60 = vmul.f32 %v1025_v58, %v455_v59 }
 0x40e   :  { %459 = vrot.lane.b32.xlu1 %v457_v60, %s1059_s18 }
 0x412   :  { %504 = vperm.xlu1 %995, %v502_v61  }
 0x413   :  { %v481_v1 = vpop.permute.xlu0 %480 }
 0x414   :  { %v483_v4 = vmul.f32 %v1027_v63, %v481_v1 }
 0x416   :  { %485 = vrot.lane.b32.xlu0 %v483_v4, %s1059_s18 }
 0x41a   :  { %510 = vperm.xlu0 %994, %v508_v5  }
 0x480   :  { %v460_v7 = vpop.permute.xlu1 %459 }
 0x481   :  { %v462_v8 = vadd.f32 %v460_v7, %v1206_v29  ;;  %v470_v29 = vmul.f32 %v1025_v58, %v1245_v21 }
 0x483   :  { %1028 = vtanh.f32 %v462_v8 }
 0x488   :  { %v486_v11 = vpop.permute.xlu0 %485 }
 0x489   :  { %v488_v12 = vadd.f32 %v486_v11, %v1218_v40  ;;  %v349_v40 = vmax.f32 %v348_v3, -1e+09 }
 0x48b   :  { %1030 = vtanh.f32 %v488_v12 }
 0x48d   :  { %v1029_v14 = vpop.eup %1028 }
 0x48e   :  { %466 = vrot.lane.b32.xlu1 %v1029_v14, %s1060_s22 }
 0x491   :  { %v1295_v18 = vpop.permute.xlu1 %504 }
 0x492   :  { %vm506_vm8 = vcmp.eq.s32.totalorder %v1295_v18, 1 }
 0x495   :  { %v1031_v17 = vpop.eup %1030 }
 0x496   :  { %492 = vrot.lane.b32.xlu0 %v1031_v17, %s1060_s22 }
 0x499   :  { %v1302_v25 = vpop.permute.xlu0 %510 }
 0x49a   :  { %vm512_vm9 = vcmp.eq.s32.totalorder %v1302_v25, 1 }
 0x500   :  { %v467_v22 = vpop.permute.xlu1 %466 }
 0x501   :  { %v469_v23 = vmul.f32 %v467_v22, %v464_v19 }
 0x503   :  { %v471_v24 = vadd.f32 %v470_v29, %v469_v23 }
 0x505   :  { %v514_v26 = vsel %vm506_vm8, %v471_v24, -1e+09  ;;  %v1309_v33 = vsel %vm506_vm8, %v471_v24, %v1245_v21 }
 0x506   :  { %v1311_v34 = vmax.f32 %v349_v40, %v514_v26  ;;  %v518_v20 = vpack.c.bf16 %v1309_v33, %v1309_v33 }
 0x508   :  { %v493_v36 = vpop.permute.xlu0 %492  ;;  %520 = vrot.lane.b32.xlu1 %v518_v20, %s1060_s22 }
 0x509   :  { %v495_v41 = vmul.f32 %v493_v36, %v490_v35 }
 0x50b   :  { %v497_v42 = vadd.f32 %v496_v39, %v495_v41 }
 0x50d   :  { %v516_v21 = vsel %vm512_vm9, %v497_v42, -1e+09  ;;  %v1326_v45 = vsel %vm512_vm9, %v497_v42, %v1256_v30 }
 0x50e   :  { %v1328_v46 = vmax.f32 %v351_v44, %v516_v21  ;;  %v565_v28 = vpack.c.bf16 %v1326_v45, %v1326_v45 }
 0x510   :  { %567 = vrot.lane.b32.xlu0 %v565_v28, %s1060_s22 }
 0x57a   :  { %v521_v47 = vpop.permute.xlu1 %520 }
 0x57b   :  { %961 = vmatmul.mubr.msk.bf16.vlgmr.msra.gmra.mrb[12].mxu0 %vm91_vm1, %v521_v47 }
 0x57c   :  { %973 = vmatpush3.bf16.msra.mxu0 %v1131_v2  ;;  %976 = vmatprep.mubr.msk.bf16.mxu0 %vm1057_vm0, %v1056_v0 }
 0x57d   :  { %974 = vmatprep.subr.bf16.mxu0 %v1056_v0 }
 0x580   :  { %975 = vmatpush3.bf16.msra.mxu0 %v1147_v6 }
 0x582   :  { %v568_v30 = vpop.permute.xlu0 %567 }
 0x583   :  { %969 = vmatmul.mubr.msk.bf16.vlgmr.msra.gmra.mrb[12].mxu1 %vm91_vm1, %v568_v30 }
 0x584   :  { %981 = vmatpush3.bf16.msra.mxu1 %v1159_v9  ;;  %984 = vmatprep.mubr.msk.bf16.mxu1 %vm1057_vm0, %v1056_v0 }
 0x585   :  { %982 = vmatprep.subr.bf16.mxu1 %v1056_v0 }
 0x588   :  { %983 = vmatpush3.bf16.msra.mxu1 %v1169_v10 }
 0x64e   :  { %v559_v2 = vpop.f32.mrb[12].mxu0 }
 0x64f   :  { %v560_v48 = vadd.f32 %v1197_v15, %v559_v2  ;;  %v962_v49 = vpop.f32.mrb[13].mxu0 }
 0x650   :  { %v562_v50 = vpop.f32.mrb[14].mxu0 }
 0x651   :  { %620 = vrot.lane.b32.xlu1 %v560_v48, %s1059_s18  ;;  %v963_v6 = vpop.f32.mrb[15].mxu0  ;;  %v612_v0 = vadd.f32 %v560_v48, %v1216_v37 }
 0x653   :  { %v891_v55 = vmul.f32 -1.442695, %v612_v0 }
 0x655   :  { %1032 = vpow2.f32 %v891_v55 }
 0x656   :  { %v606_v51 = vpop.f32.mrb[12].mxu1 }
 0x657   :  { %v607_v52 = vadd.f32 %v1213_v32, %v606_v51  ;;  %v970_v53 = vpop.f32.mrb[13].mxu1 }
 0x658   :  { %v609_v9 = vpop.f32.mrb[14].mxu1 }
 0x659   :  { %646 = vrot.lane.b32.xlu0 %v607_v52, %s1059_s18  ;;  %v971_v54 = vpop.f32.mrb[15].mxu1  ;;  %v638_v10 = vadd.f32 %v607_v52, %v1208_v31 }
 0x65b   :  { %v892_v56 = vmul.f32 -1.442695, %v638_v10 }
 0x65d   :  { %1034 = vpow2.f32 %v892_v56 }
 0x65f   :  { %v1033_v57 = vpop.eup %1032 }
 0x660   :  { %v616_v58 = vadd.f32 1.0, %v1033_v57 }
 0x662   :  { %1036 = vrcp.f32 %v616_v58 }
 0x667   :  { %v1035_v59 = vpop.eup %1034 }
 0x668   :  { %v642_v60 = vadd.f32 1.0, %v1035_v59 }
 0x66a   :  { %1038 = vrcp.f32 %v642_v60 }
 0x66c   :  { %v1037_v61 = vpop.eup %1036 }
 0x66d   :  { %v630_v19 = vsub.f32 1.0, %v1037_v61  ;;  %v636_v3 = vmul.f32 %v1037_v61, %v1309_v33 }
 0x674   :  { %v1039_v1 = vpop.eup %1038 }
 0x675   :  { %v656_v26 = vsub.f32 1.0, %v1039_v1  ;;  %v662_v35 = vmul.f32 %v1039_v1, %v1326_v45 }
 0x6c3   :  { %v621_v62 = vpop.permute.xlu1 %620 }
 0x6c4   :  { %v623_v63 = vmul.f32 %v1037_v61, %v621_v62 }
 0x6c6   :  { %625 = vrot.lane.b32.xlu1 %v623_v63, %s1059_s18 }
 0x6cb   :  { %v647_v4 = vpop.permute.xlu0 %646 }
 0x6cc   :  { %v649_v5 = vmul.f32 %v1039_v1, %v647_v4  ;;  %v897_v1 = vld [vmem:[%s1437_s8] ss:$0 sm:$0xff] }
 0x6ce   :  { %651 = vrot.lane.b32.xlu0 %v649_v5, %s1059_s18 }
 0x738   :  { %v626_v7 = vpop.permute.xlu1 %625 }
 0x739   :  { %v628_v8 = vadd.f32 %v626_v7, %v1216_v37 }
 0x73b   :  { %1040 = vtanh.f32 %v628_v8 }
 0x740   :  { %v652_v11 = vpop.permute.xlu0 %651 }
 0x741   :  { %v654_v12 = vadd.f32 %v652_v11, %v1208_v31 }
 0x743   :  { %1042 = vtanh.f32 %v654_v12 }
 0x745   :  { %v1041_v14 = vpop.eup %1040 }
 0x746   :  { %632 = vrot.lane.b32.xlu1 %v1041_v14, %s1060_s22 }
 0x74d   :  { %v1043_v17 = vpop.eup %1042 }
 0x74e   :  { %658 = vrot.lane.b32.xlu0 %v1043_v17, %s1060_s22 }
 0x7b8   :  { %v633_v22 = vpop.permute.xlu1 %632 }
 0x7b9   :  { %v635_v29 = vmul.f32 %v633_v22, %v630_v19 }
 0x7bb   :  { %v637_v23 = vadd.f32 %v636_v3, %v635_v29 }
 0x7bd   :  { %v1360_v37 = vsel %vm512_vm9, %v637_v23, -1e+09  ;;  %v1365_v31 = vsel %vm512_vm9, %v637_v23, %v1309_v33 }
 0x7be   :  { %v670_v24 = vpack.c.bf16 %v1365_v31, %v1365_v31  ;;  %v667_v40 = vmax.f32 %v1311_v34, %v1360_v37 }
 0x7c0   :  { %v659_v20 = vpop.permute.xlu0 %658  ;;  %672 = vrot.lane.b32.xlu1 %v670_v24, %s1060_s22 }
 0x7c1   :  { %v661_v36 = vmul.f32 %v659_v20, %v656_v26 }
 0x7c3   :  { %v663_v38 = vadd.f32 %v662_v35, %v661_v36 }
 0x7c5   :  { %v1375_v39 = vsel %vm506_vm8, %v663_v38, -1e+09  ;;  %v1380_v25 = vsel %vm506_vm8, %v663_v38, %v1326_v45  ;;  %v899_v38 = vld [vmem:[#allocation2] ss:$0 sm:$0xff] }
 0x7c6   :  { %v717_v33 = vpack.c.bf16 %v1380_v25, %v1380_v25  ;;  %v669_v41 = vmax.f32 %v1328_v46, %v1375_v39 }
 0x7c8   :  { %719 = vrot.lane.b32.xlu0 %v717_v33, %s1060_s22 }
 0x832   :  { %v673_v42 = vpop.permute.xlu1 %672 }
 0x833   :  { %977 = vmatmul.mubr.msk.bf16.vlgmr.msra.gmra.mrb[16].mxu0 %vm91_vm1, %v673_v42 }
 0x83a   :  { %v720_v44 = vpop.permute.xlu0 %719 }
 0x83b   :  { %985 = vmatmul.mubr.msk.bf16.vlgmr.msra.gmra.mrb[16].mxu1 %vm91_vm1, %v720_v44 }
 0x906   :  { %v711_v21 = vpop.f32.mrb[16].mxu0 }
 0x907   :  { %v712_v28 = vadd.f32 %v1197_v15, %v711_v21  ;;  %v978_v18 = vpop.f32.mrb[17].mxu0 }
 0x908   :  { %v714_v45 = vpop.f32.mrb[18].mxu0 }
 0x909   :  { %772 = vrot.lane.b32.xlu1 %v712_v28, %s1059_s18  ;;  %v979_v47 = vpop.f32.mrb[19].mxu0  ;;  %v764_v6 = vadd.f32 %v712_v28, %v1221_v43 }
 0x90b   :  { %v895_v51 = vmul.f32 -1.442695, %v764_v6 }
 0x90d   :  { %1044 = vpow2.f32 %v895_v51 }
 0x90e   :  { %v758_v30 = vpop.f32.mrb[16].mxu1 }
 0x90f   :  { %v759_v2 = vadd.f32 %v1213_v32, %v758_v30  ;;  %v986_v48 = vpop.f32.mrb[17].mxu1 }
 0x910   :  { %v761_v49 = vpop.f32.mrb[18].mxu1 }
 0x911   :  { %798 = vrot.lane.b32.xlu0 %v759_v2, %s1059_s18  ;;  %v987_v50 = vpop.f32.mrb[19].mxu1  ;;  %v790_v52 = vadd.f32 %v759_v2, %v1204_v27 }
 0x913   :  { %v896_v15 = vmul.f32 -1.442695, %v790_v52 }
 0x915   :  { %1046 = vpow2.f32 %v896_v15 }
 0x917   :  { %v1045_v53 = vpop.eup %1044 }
 0x918   :  { %v768_v9 = vadd.f32 1.0, %v1045_v53 }
 0x91a   :  { %1048 = vrcp.f32 %v768_v9 }
 0x91f   :  { %v1047_v54 = vpop.eup %1046 }
 0x920   :  { %v794_v0 = vadd.f32 1.0, %v1047_v54 }
 0x922   :  { %1050 = vrcp.f32 %v794_v0 }
 0x924   :  { %v1049_v32 = vpop.eup %1048 }
 0x925   :  { %v782_v5 = vsub.f32 1.0, %v1049_v32  ;;  %v788_v7 = vmul.f32 %v1049_v32, %v1365_v31 }
 0x92c   :  { %v1051_v56 = vpop.eup %1050 }
 0x92d   :  { %v808_v19 = vsub.f32 1.0, %v1051_v56  ;;  %v814_v29 = vmul.f32 %v1051_v56, %v1380_v25 }
 0x97b   :  { %v773_v55 = vpop.permute.xlu1 %772 }
 0x97c   :  { %v775_v10 = vmul.f32 %v1049_v32, %v773_v55 }
 0x97e   :  { %777 = vrot.lane.b32.xlu1 %v775_v10, %s1059_s18 }
 0x983   :  { %v799_v57 = vpop.permute.xlu0 %798 }
 0x984   :  { %v801_v58 = vmul.f32 %v1051_v56, %v799_v57 }
 0x986   :  { %803 = vrot.lane.b32.xlu0 %v801_v58, %s1059_s18 }
 0x9f0   :  { %v778_v59 = vpop.permute.xlu1 %777 }
 0x9f1   :  { %v780_v60 = vadd.f32 %v778_v59, %v1221_v43  ;;  %v898_v43 = vld [vmem:[%s1438_s9] ss:$0 sm:$0xff] }
 0x9f3   :  { %1052 = vtanh.f32 %v780_v60 }
 0x9f8   :  { %v804_v61 = vpop.permute.xlu0 %803 }
 0x9f9   :  { %v806_v62 = vadd.f32 %v804_v61, %v1204_v27 }
 0x9fb   :  { %1054 = vtanh.f32 %v806_v62 }
 0x9fd   :  { %v1053_v63 = vpop.eup %1052 }
 0x9fe   :  { %784 = vrot.lane.b32.xlu1 %v1053_v63, %s1060_s22 }
 0xa02   :  { %826 = vrot.lane.b32.xlu1 %v897_v1, %s1061_s28 }
 0xa05   :  { %v1055_v4 = vpop.eup %1054 }
 0xa06   :  { %810 = vrot.lane.b32.xlu0 %v1055_v4, %s1060_s22 }
 0xa0a   :  { %843 = vrot.lane.b32.xlu0 %v898_v43, %s1061_s28 }
 0xa70   :  { %v785_v27 = vpop.permute.xlu1 %784 }
 0xa71   :  { %v787_v8 = vmul.f32 %v785_v27, %v782_v5 }
 0xa73   :  { %v789_v11 = vadd.f32 %v788_v7, %v787_v8 }
 0xa74   :  { %v827_v14 = vpop.permute.xlu1 %826 }
 0xa75   :  { %v816_v12 = vsel %vm346_vm5, %v789_v11, -1e+09 }
 0xa76   :  { %v817_v17 = vmax.f32 %v667_v40, %v816_v12 }
 0xa78   :  { %v829_v22 = vmul.f32 %v827_v14, %v817_v17  ;;  %v811_v3 = vpop.permute.xlu0 %810 }
 0xa79   :  { %v813_v23 = vmul.f32 %v811_v3, %v808_v19 }
 0xa7a   :  { %831 = vrot.lane.b32.xlu1 %v829_v22, %s1060_s22 }
 0xa7b   :  { %v815_v24 = vadd.f32 %v814_v29, %v813_v23 }
 0xa7c   :  { %v844_v26 = vpop.permute.xlu0 %843 }
 0xa7d   :  { %v818_v31 = vsel %vm340_vm4, %v815_v24, -1e+09 }
 0xa7e   :  { %v819_v13 = vmax.f32 %v669_v41, %v818_v31 }
 0xa80   :  { %v846_v20 = vmul.f32 %v844_v26, %v819_v13 }
 0xa82   :  { %848 = vrot.lane.b32.xlu0 %v846_v20, %s1060_s22 }
 0xaec   :  { %v832_v34 = vpop.permute.xlu1 %831 }
 0xaed   :  { %v834_v37 = vsel %vm91_vm1, %v832_v34, 0.0 }
 0xaee   :  { %835 = vadd.xlane.f32.xlu1 %v834_v37 }
 0xaf4   :  { %v849_v40 = vpop.permute.xlu0 %848 }
 0xaf5   :  { %v851_v35 = vsel %vm91_vm1, %v849_v40, 0.0 }
 0xaf6   :  { %852 = vadd.xlane.f32.xlu0 %v851_v35 }
 0xb7b   :  { %v836_v36 = vpop.xlane.xlu1 %835 }
 0xb83   :  { %v853_v46 = vpop.xlane.xlu0 %852 }
 0xb84   :  { %v854_v39 = vadd.f32 %v853_v46, %v836_v36 }
 0xb86   :  { %v862_v25 = vadd.f32 %v899_v38, %v854_v39 }
 0xb88   :  { %864 = vst.msk [vmem:[%s1440_s11] sm:$0xff] %vm863_vm10, %v862_v25 }

</bundles_post_ra>
